<compile_context>
chip_gen: v6e
topology: v6e:2x2x1
jax: 0.10.0
libtpu: 0.0.40
codegen_flags: <defaults>
</compile_context>

<pallas_src>
import jax
import jax.numpy as jnp
from jax.experimental import pallas as pl
from jax.experimental.pallas import tpu as pltpu


def _nonlocal_kernel(theta_ref, y_ref, phi_wT_ref, phi_b_ref, w_w_ref, w_b_ref,
                     out_ref, acc_scr):
    j = pl.program_id(1)
    n_j = pl.num_programs(1)
    tile_j = y_ref.shape[0]

    @pl.when(j == 0)
    def _():
        acc_scr[...] = jnp.zeros_like(acc_scr)

    # phi (1x1 conv) on this column block of the ref feature: (tile_j, Cint).
    phi_blk = (jnp.dot(y_ref[...], phi_wT_ref[...],
                       preferred_element_type=jnp.float32) + phi_b_ref[...])

    # fT[jj, i] = f[i, col0 + jj] = <theta_x[i, :], phi_y[:, col0 + jj]> -> (tile_j, N)
    fT = jnp.dot(phi_blk.astype(jnp.bfloat16), theta_ref[...],
                 preferred_element_type=jnp.float32)

    # F.softmax(f, dim=1): normalize over i, the lane axis of fT.  Columns of f
    # are independent, so the per-j-tile softmax is exact.
    m = jnp.max(fT, axis=1, keepdims=True)
    e = jnp.exp(fT - m)
    s = jnp.sum(e, axis=1, keepdims=True)
    pT = e * pl.reciprocal(s, approx=True)                          # (tile_j, N)

    # x1^T[c, i] += sum_jj theta^T[c, col0+jj] * pT[jj, i]
    col0 = pl.multiple_of(j * tile_j, tile_j)
    acc_scr[...] += jnp.dot(theta_ref[:, pl.ds(col0, tile_j)],      # bf16 slice, no cast
                            pT.astype(jnp.bfloat16),
                            preferred_element_type=jnp.float32)

    @pl.when(j == n_j - 1)
    def _():
        # W: 1x1 conv (zero-initialized in the module), lane-dense (Cin, N) output.
        out_ref[...] = (jnp.dot(w_w_ref[...], acc_scr[...],
                                preferred_element_type=jnp.float32)
                        + w_b_ref[...]).astype(out_ref.dtype)


def _pick_tile_j(n, desired):
    """Largest multiple-of-8 divisor of n that is <= desired, else one full tile."""
    desired = max(8, min(desired, n))
    if n <= desired:
        return n
    t = desired - (desired % 8)
    while t >= 8:
        if n % t == 0:
            return t
        t -= 8
    return n


def non_local_forward(supp, ref, params, *, tile_j=256):
    """tile_j=256 fills the 256-wide MXU contraction on v6e/v7x; use 128 on v5e."""
    B, Cin, H, W = supp.shape
    N = H * W
    Cint = params["theta_w"].shape[0]

    tile_j = _pick_tile_j(N, tile_j)
    n_j = N // tile_j

    # theta: 3x3 conv, padding=1.  Done by XLA in the wrapper (tiny vs. the
    # O(N^2) attention); this removes the 9x im2col HBM expansion entirely.
    # TODO(synk): fold this conv into the kernel as 9 shifted matmuls against a
    # padded VMEM copy if wrapper-side fusion ever becomes a bottleneck.
    theta_x = jax.lax.conv_general_dilated(
        supp, params["theta_w"], (1, 1), "SAME",
        dimension_numbers=("NCHW", "OIHW", "NCHW"))
    theta_x = theta_x + params["theta_b"][None, :, None, None]
    theta_n = theta_x.reshape(B, Cint, N).astype(jnp.bfloat16)      # (B, Cint, N)

    # Small channels-last bf16 copy of the ref feature so every in-kernel matmul
    # is a plain (M,K)@(K,N); this is the only wrapper transpose and it is tiny.
    y_nc = ref.reshape(B, Cin, N).transpose(0, 2, 1).astype(jnp.bfloat16)  # (B, N, Cin)

    phi_wT = params["phi_w"][:, :, 0, 0].T.astype(jnp.bfloat16)     # (Cin, Cint)
    phi_b = params["phi_b"].reshape(1, Cint).astype(jnp.float32)
    w_w = params["w_w"][:, :, 0, 0].astype(jnp.float32)             # (Cin, Cint)
    w_b = params["w_b"].reshape(Cin, 1).astype(jnp.float32)

    # Explicit VMEM budget: double-buffered blocks + acc scratch + softmax
    # temporaries (fT/e/pT and a bf16 copy), with 2x margin, >= 32 MiB floor.
    est_bytes = (2 * Cint * N * 2          # theta bf16 block (resident, dbl-buffered)
                 + 2 * tile_j * Cin * 2    # ref column block
                 + 2 * Cin * N * 4         # output block
                 + Cint * N * 4            # accumulator scratch
                 + 6 * tile_j * N * 4)     # fT / e / pT temporaries
    vmem_limit = int(min(max(2 * est_bytes, 32 * 1024 * 1024), 128 * 1024 * 1024))

    # TODO(synk): on v7x with B == 1 the single 'parallel' batch axis feeds only
    # one of the two TensorCores; split the j reduction per-core with a final
    # cross-core add if that case matters.
    out = pl.pallas_call(
        _nonlocal_kernel,
        out_shape=jax.ShapeDtypeStruct((B, Cin, N), jnp.float32),
        grid=(B, n_j),
        in_specs=[
            pl.BlockSpec((None, Cint, N), lambda b, j: (b, 0, 0)),       # theta (resident over j)
            pl.BlockSpec((None, tile_j, Cin), lambda b, j: (b, j, 0)),   # ref column block
            pl.BlockSpec((Cin, Cint), lambda b, j: (0, 0)),              # phi weight^T
            pl.BlockSpec((1, Cint), lambda b, j: (0, 0)),                # phi bias
            pl.BlockSpec((Cin, Cint), lambda b, j: (0, 0)),              # W weight
            pl.BlockSpec((Cin, 1), lambda b, j: (0, 0)),                 # W bias
        ],
        out_specs=pl.BlockSpec((None, Cin, N), lambda b, j: (b, 0, 0)),
        scratch_shapes=[
            pltpu.VMEM((Cint, N), jnp.float32),   # x1 accumulator, transposed (Cint, N)
        ],
        compiler_params=pltpu.CompilerParams(
            dimension_semantics=("parallel", "arbitrary"),
            vmem_limit_bytes=vmem_limit),
    )(theta_n, y_nc, phi_wT, phi_b, w_w, w_b)

    # Lane-dense output: just a reshape back to NCHW, no transpose.
    return out.reshape(B, Cin, H, W)


def _reference_forward(supp, ref, params):
    """Plain-JAX mirror of Non_local.forward (for numerical validation)."""
    B, Cin, H, W = supp.shape
    N = H * W
    Cint = params["theta_w"].shape[0]
    theta_x = jax.lax.conv_general_dilated(
        supp, params["theta_w"], (1, 1), "SAME",
        dimension_numbers=("NCHW", "OIHW", "NCHW"))
    theta_x = theta_x + params["theta_b"][None, :, None, None]
    theta_x = theta_x.reshape(B, Cint, N).transpose(0, 2, 1)              # (B, N, Cint)
    phi_y = jnp.einsum("oc,bcn->bon", params["phi_w"][:, :, 0, 0],
                       ref.reshape(B, Cin, N)) + params["phi_b"][None, :, None]
    f = jnp.einsum("bic,bcj->bij", theta_x, phi_y)                        # (B, N, N)
    f_div_c = jax.nn.softmax(f, axis=1)
    x1 = jnp.einsum("bij,bjc->bic", f_div_c, theta_x)                     # (B, N, Cint)
    x1 = x1.transpose(0, 2, 1)                                            # (B, Cint, N)
    z = (jnp.einsum("oc,bcn->bon", params["w_w"][:, :, 0, 0], x1)
         + params["w_b"][None, :, None])
    return z.reshape(B, Cin, H, W)


if __name__ == "__main__":
    B, Cin, Cint, H, W = 2, 4, 8, 16, 16

    key = jax.random.PRNGKey(0)
    k1, k2, k3, k4, k5, k6, k7, k8 = jax.random.split(key, 8)
    supp = jax.random.normal(k1, (B, Cin, H, W), jnp.float32)
    ref = jax.random.normal(k2, (B, Cin, H, W), jnp.float32)

    # Module-faithful params (Non_local.__init__): W weight/bias are zero-initialized.
    # NOTE: self.g and self.act exist in __init__ but are never used in forward.
    params = {
        "theta_w": 0.1 * jax.random.normal(k3, (Cint, Cin, 3, 3), jnp.float32),
        "theta_b": 0.1 * jax.random.normal(k4, (Cint,), jnp.float32),
        "phi_w": 0.1 * jax.random.normal(k5, (Cint, Cin, 1, 1), jnp.float32),
        "phi_b": 0.1 * jax.random.normal(k6, (Cint,), jnp.float32),
        "w_w": jnp.zeros((Cin, Cint, 1, 1), jnp.float32),
        "w_b": jnp.zeros((Cin,), jnp.float32),
    }

    # Faithful forward with default tile_j (zero-init W -> output exactly zero, like the module).
    z = non_local_forward(supp, ref, params)
    jax.block_until_ready(z)
    assert z.shape == (B, Cin, H, W)
    assert bool(jnp.all(jnp.isfinite(z)))

    # Validate the full attention path numerically with non-zero W weights, and
    # use tile_j=128 so the j-accumulation path (n_j > 1) is exercised too.
    params_chk = dict(params)
    params_chk["w_w"] = 0.1 * jax.random.normal(k7, (Cin, Cint, 1, 1), jnp.float32)
    params_chk["w_b"] = 0.1 * jax.random.normal(k8, (Cin,), jnp.float32)
    z_kernel = non_local_forward(supp, ref, params_chk, tile_j=128)
    z_kernel_full = non_local_forward(supp, ref, params_chk)   # n_j == 1 path
    z_ref = _reference_forward(supp, ref, params_chk)
    jax.block_until_ready((z_kernel, z_kernel_full, z_ref))
    max_err = float(jnp.max(jnp.abs(z_kernel - z_ref)))
    max_err_full = float(jnp.max(jnp.abs(z_kernel_full - z_ref)))
    assert max_err < 5e-2, f"kernel/reference mismatch (tiled): max abs err {max_err}"
    assert max_err_full < 5e-2, f"kernel/reference mismatch (full): max abs err {max_err_full}"

    print("KERNEL_OK")
</pallas_src>

<mosaic_0001>
module attributes {stable_mosaic.version = 11 : i64} {
  func.func @_nonlocal_kernel(%arg0: i32, %arg1: i32, %arg2: memref<1x8x256xbf16, #tpu.memory_space<vmem>>, %arg3: memref<1x256x4xbf16, #tpu.memory_space<vmem>>, %arg4: memref<4x8xbf16, #tpu.memory_space<vmem>>, %arg5: memref<1x8xf32, #tpu.memory_space<vmem>>, %arg6: memref<4x8xf32, #tpu.memory_space<vmem>>, %arg7: memref<4x1xf32, #tpu.memory_space<vmem>>, %arg8: memref<1x4x256xf32, #tpu.memory_space<vmem>>, %arg9: memref<8x256xf32, #tpu.memory_space<vmem>>) attributes {dimension_semantics = [#tpu.dimension_semantics<parallel>, #tpu.dimension_semantics<arbitrary>], iteration_bounds = array<i64: 2, 1>, scalar_prefetch = 0 : i64, scratch_operands = 1 : i64, tpu.core_type = #tpu.core_type<tc>, window_params = [{transform_indices = @transform_0, window_bounds = array<i64: 1, 8, 256>}, {transform_indices = @transform_1, window_bounds = array<i64: 1, 256, 4>}, {pipeline_mode = #tpu.pipeline_mode<synchronous>, transform_indices = @transform_2, window_bounds = array<i64: 4, 8>}, {pipeline_mode = #tpu.pipeline_mode<synchronous>, transform_indices = @transform_3, window_bounds = array<i64: 1, 8>}, {pipeline_mode = #tpu.pipeline_mode<synchronous>, transform_indices = @transform_4, window_bounds = array<i64: 4, 8>}, {pipeline_mode = #tpu.pipeline_mode<synchronous>, transform_indices = @transform_5, window_bounds = array<i64: 4, 1>}, {transform_indices = @transform_6, window_bounds = array<i64: 1, 4, 256>}]} {
    %c0_i32 = arith.constant 0 : i32
    %0 = arith.cmpi eq, %arg1, %c0_i32 : i32
    %1 = arith.extui %0 : i1 to i32
    %c0_i32_0 = arith.constant 0 : i32
    %2 = arith.cmpi ne, %1, %c0_i32_0 : i32
    scf.if %2 {
      %cst_22 = arith.constant 0.000000e+00 : f32
      %37 = vector.broadcast %cst_22 : f32 to vector<8x256xf32>
      %c0_23 = arith.constant 0 : index
      %c0_24 = arith.constant 0 : index
      %38 = vector.load %arg9[%c0_23, %c0_24] : memref<8x256xf32, #tpu.memory_space<vmem>>, vector<8x256xf32>
      tpu.vector_store %arg9[%c0_23, %c0_24], %37 {strides = array<i32>} : memref<8x256xf32, #tpu.memory_space<vmem>>, vector<8x256xf32>,
    } else {
    }
    %c0 = arith.constant 0 : index
    %c0_1 = arith.constant 0 : index
    %c0_2 = arith.constant 0 : index
    %3 = vector.load %arg3[%c0, %c0_1, %c0_2] : memref<1x256x4xbf16, #tpu.memory_space<vmem>>, vector<1x256x4xbf16>
    %4 = vector.shape_cast %3 : vector<1x256x4xbf16> to vector<256x4xbf16>
    %c0_3 = arith.constant 0 : index
    %c0_4 = arith.constant 0 : index
    %5 = vector.load %arg4[%c0_3, %c0_4] : memref<4x8xbf16, #tpu.memory_space<vmem>>, vector<4x8xbf16>
    %cst = arith.constant dense<0.000000e+00> : vector<256x8xf32>
    %6 = tpu.matmul %4, %5, %cst {dimension_numbers = #tpu.dot_dimension_numbers<[1], [0], [0], [1], [0, 0, 1, 1], [], []>} : vector<256x4xbf16>, vector<4x8xbf16>, vector<256x8xf32> -> vector<256x8xf32>
    %c0_5 = arith.constant 0 : index
    %c0_6 = arith.constant 0 : index
    %7 = vector.load %arg5[%c0_5, %c0_6] : memref<1x8xf32, #tpu.memory_space<vmem>>, vector<1x8xf32>
    %8 = vector.broadcast %7 : vector<1x8xf32> to vector<256x8xf32>
    %9 = arith.addf %6, %8 : vector<256x8xf32>
    %10 = arith.truncf %9 : vector<256x8xf32> to vector<256x8xbf16>
    %c0_7 = arith.constant 0 : index
    %c0_8 = arith.constant 0 : index
    %c0_9 = arith.constant 0 : index
    %11 = vector.load %arg2[%c0_7, %c0_8, %c0_9] : memref<1x8x256xbf16, #tpu.memory_space<vmem>>, vector<1x8x256xbf16>
    %12 = vector.shape_cast %11 : vector<1x8x256xbf16> to vector<8x256xbf16>
    %cst_10 = arith.constant dense<0.000000e+00> : vector<256x256xf32>
    %13 = tpu.matmul %10, %12, %cst_10 {dimension_numbers = #tpu.dot_dimension_numbers<[1], [0], [0], [1], [0, 0, 1, 1], [], []>} : vector<256x8xbf16>, vector<8x256xbf16>, vector<256x256xf32> -> vector<256x256xf32>
    %cst_11 = arith.constant dense<0xFF800000> : vector<256xf32>
    %14 = vector.multi_reduction <maximumf>, %13, %cst_11 [1] : vector<256x256xf32> to vector<256xf32>
    %15 = vector.shape_cast %14 : vector<256xf32> to vector<256x1xf32>
    %16 = vector.broadcast %15 : vector<256x1xf32> to vector<256x256xf32>
    %17 = arith.subf %13, %16 : vector<256x256xf32>
    %18 = math.exp %17 : vector<256x256xf32>
    %cst_12 = arith.constant dense<0.000000e+00> : vector<256xf32>
    %19 = vector.multi_reduction <add>, %18, %cst_12 [1] : vector<256x256xf32> to vector<256xf32>
    %20 = vector.shape_cast %19 : vector<256xf32> to vector<256x1xf32>
    %21 = tpu.reciprocal %20 {approx = true} : vector<256x1xf32> -> vector<256x1xf32>
    %22 = vector.broadcast %21 : vector<256x1xf32> to vector<256x256xf32>
    %23 = arith.mulf %18, %22 : vector<256x256xf32>
    %c256_i32 = arith.constant 256 : i32
    %24 = arith.muli %arg1, %c256_i32 : i32
    %25 = tpu.assume_multiple %24, 256 : i32
    %c0_13 = arith.constant 0 : index
    %c0_14 = arith.constant 0 : index
    %26 = vector.load %arg9[%c0_13, %c0_14] : memref<8x256xf32, #tpu.memory_space<vmem>>, vector<8x256xf32>
    %c0_15 = arith.constant 0 : index
    %c0_16 = arith.constant 0 : index
    %27 = arith.index_cast %25 : i32 to index
    %28 = vector.load %arg2[%c0_15, %c0_16, %27] : memref<1x8x256xbf16, #tpu.memory_space<vmem>>, vector<1x8x256xbf16>
    %29 = vector.shape_cast %28 : vector<1x8x256xbf16> to vector<8x256xbf16>
    %30 = arith.truncf %23 : vector<256x256xf32> to vector<256x256xbf16>
    %cst_17 = arith.constant dense<0.000000e+00> : vector<8x256xf32>
    %31 = tpu.matmul %29, %30, %cst_17 {dimension_numbers = #tpu.dot_dimension_numbers<[1], [0], [0], [1], [0, 0, 1, 1], [], []>} : vector<8x256xbf16>, vector<256x256xbf16>, vector<8x256xf32> -> vector<8x256xf32>
    %32 = arith.addf %26, %31 : vector<8x256xf32>
    %c0_18 = arith.constant 0 : index
    %c0_19 = arith.constant 0 : index
    %33 = vector.load %arg9[%c0_18, %c0_19] : memref<8x256xf32, #tpu.memory_space<vmem>>, vector<8x256xf32>
    tpu.vector_store %arg9[%c0_18, %c0_19], %32 {strides = array<i32>} : memref<8x256xf32, #tpu.memory_space<vmem>>, vector<8x256xf32>,
    %c0_i32_20 = arith.constant 0 : i32
    %34 = arith.cmpi eq, %arg1, %c0_i32_20 : i32
    %35 = arith.extui %34 : i1 to i32
    %c0_i32_21 = arith.constant 0 : i32
    %36 = arith.cmpi ne, %35, %c0_i32_21 : i32
    scf.if %36 {
      %c0_22 = arith.constant 0 : index
      %c0_23 = arith.constant 0 : index
      %37 = vector.load %arg6[%c0_22, %c0_23] : memref<4x8xf32, #tpu.memory_space<vmem>>, vector<4x8xf32>
      %c0_24 = arith.constant 0 : index
      %c0_25 = arith.constant 0 : index
      %38 = vector.load %arg9[%c0_24, %c0_25] : memref<8x256xf32, #tpu.memory_space<vmem>>, vector<8x256xf32>
      %cst_26 = arith.constant dense<0.000000e+00> : vector<4x256xf32>
      %39 = tpu.matmul %37, %38, %cst_26 {dimension_numbers = #tpu.dot_dimension_numbers<[1], [0], [0], [1], [0, 0, 1, 1], [], []>} : vector<4x8xf32>, vector<8x256xf32>, vector<4x256xf32> -> vector<4x256xf32>
      %c0_27 = arith.constant 0 : index
      %c0_28 = arith.constant 0 : index
      %40 = vector.load %arg7[%c0_27, %c0_28] : memref<4x1xf32, #tpu.memory_space<vmem>>, vector<4x1xf32>
      %41 = vector.broadcast %40 : vector<4x1xf32> to vector<4x256xf32>
      %42 = arith.addf %39, %41 : vector<4x256xf32>
      %c0_29 = arith.constant 0 : index
      %c0_30 = arith.constant 0 : index
      %c0_31 = arith.constant 0 : index
      %43 = vector.load %arg8[%c0_29, %c0_30, %c0_31] : memref<1x4x256xf32, #tpu.memory_space<vmem>>, vector<1x4x256xf32>
      %44 = vector.shape_cast %43 : vector<1x4x256xf32> to vector<4x256xf32>
      %45 = vector.shape_cast %42 : vector<4x256xf32> to vector<1x4x256xf32>
      tpu.vector_store %arg8[%c0_29, %c0_30, %c0_31], %45 {strides = array<i32>} : memref<1x4x256xf32, #tpu.memory_space<vmem>>, vector<1x4x256xf32>,
    } else {
    }
    return
  }
  func.func @transform_0(%arg0: i32, %arg1: i32) -> (i32, i32, i32) {
    %c0_i32 = arith.constant 0 : i32
    %c0_i32_0 = arith.constant 0 : i32
    %c0_i32_1 = arith.constant 0 : i32
    return %arg0, %c0_i32, %c0_i32_0 : i32, i32, i32
  }
  func.func @transform_1(%arg0: i32, %arg1: i32) -> (i32, i32, i32) {
    %c0_i32 = arith.constant 0 : i32
    %c0_i32_0 = arith.constant 0 : i32
    return %arg0, %arg1, %c0_i32 : i32, i32, i32
  }
  func.func @transform_2(%arg0: i32, %arg1: i32) -> (i32, i32) {
    %c0_i32 = arith.constant 0 : i32
    %c0_i32_0 = arith.constant 0 : i32
    %c0_i32_1 = arith.constant 0 : i32
    return %c0_i32, %c0_i32_0 : i32, i32
  }
  func.func @transform_3(%arg0: i32, %arg1: i32) -> (i32, i32) {
    %c0_i32 = arith.constant 0 : i32
    %c0_i32_0 = arith.constant 0 : i32
    %c0_i32_1 = arith.constant 0 : i32
    return %c0_i32, %c0_i32_0 : i32, i32
  }
  func.func @transform_4(%arg0: i32, %arg1: i32) -> (i32, i32) {
    %c0_i32 = arith.constant 0 : i32
    %c0_i32_0 = arith.constant 0 : i32
    %c0_i32_1 = arith.constant 0 : i32
    return %c0_i32, %c0_i32_0 : i32, i32
  }
  func.func @transform_5(%arg0: i32, %arg1: i32) -> (i32, i32) {
    %c0_i32 = arith.constant 0 : i32
    %c0_i32_0 = arith.constant 0 : i32
    %c0_i32_1 = arith.constant 0 : i32
    return %c0_i32, %c0_i32_0 : i32, i32
  }
  func.func @transform_6(%arg0: i32, %arg1: i32) -> (i32, i32, i32) {
    %c0_i32 = arith.constant 0 : i32
    %c0_i32_0 = arith.constant 0 : i32
    %c0_i32_1 = arith.constant 0 : i32
    return %arg0, %c0_i32, %c0_i32_0 : i32, i32, i32
  }
}

</mosaic_0001>

<bundles_post_ra>
// kernel: tpu_custom_call.1
= control target key start
LH: loop header
LB: loop body
LE: loop exit
PB: predicated region body
PF: predicated region fallthrough
CT: control target
= control target key end

     0   :  { %11 = vsyncpa [#allocation4], 0  ;;  %s2926_s0 = inlined_call_operand.vmem [shape: bf16[2,8,256], index: 0, kind: input, shape index: {}]   ;;  %s2927_s1 = inlined_call_operand.vmem [shape: bf16[2,256,4], index: 1, kind: input, shape index: {}]   ;;  %s2928_s2 = inlined_call_operand.vmem [shape: bf16[4,8], index: 2, kind: input, shape index: {}]   ;;  %s2929_s3 = inlined_call_operand.vmem [shape: f32[1,8], index: 3, kind: input, shape index: {}]   ;;  %s2930_s4 = inlined_call_operand.vmem [shape: f32[4,8], index: 4, kind: input, shape index: {}]   ;;  %s2931_s5 = inlined_call_operand.vmem [shape: f32[4,1], index: 5, kind: input, shape index: {}]   ;;  %s2932_s6 = inlined_call_operand.hbm [shape: f32[2,4,256], index: 6, kind: output, shape index: {}]  }
   0x1   :  { %13 = vsyncpa [#allocation4 + $0x1], 0  ;;  %s2186_s21 = smov 0   ;;  %s2188_s22 = smov 0  }
   0x2   :  { %s2190_s23 = smov 0   ;;  %s2192_s24 = smov 0  }
   0x3   :  { %s2194_s25 = smov 0   ;;  %s2196_s26 = smov 0  }
   0x4 LB: > { %s1675_s27 = sadd.s32 4294967295, %s2146_s26   ;;  %s1676_s28 = sadd.s32 4294967294, %s2146_s26   ;;  %s2146_s26 = sphi %s2196_s26, %s19_s26   ;;  %s2142_s25 = sphi %s2194_s25, %s3041_s25   ;;  %s2138_s24 = sphi %s2192_s24, %s3040_s24   ;;  %s2134_s23 = sphi %s2190_s23, %s3039_s23   ;;  %s2130_s22 = sphi %s2188_s22, %s3038_s22   ;;  %s2126_s21 = sphi %s2186_s21, %s3037_s21  }
   0x5   : > { %s31_s29 = sadd.s32 1, %s2142_s25  ;;  %s176_s30 = sadd.s32 1, %s2134_s23 }
   0x6   : > { %p33_p0 = scmp.ge.s32.totalorder %s31_s29, 2  ;;  %p186_p1 = scmp.ne.s32.totalorder %s2134_s23, %s2130_s22 }
   0x7   : > { %p187_p2 = scmp.eq.s32.totalorder %s1675_s27, 1  ;;  %p192_p3 = scmp.ne.s32.totalorder %s2130_s22, %s2126_s21 }
   0x8   : > { %s3043_s29 = smov (%p33_p0, %s31_s29), 0  ;;  %p193_p5 = scmp.eq.s32.totalorder %s1676_s28, 1 }
   0x9   : > { %p2226_p4 = por %p187_p2, %p186_p1  ;;  %s173_s8 = ssub.s32 %s2142_s25, %s3043_s29 }
   0xa   : > { %p1679_p6 = scmp.ge.s32.totalorder %s2146_s26, 1  ;;  %p174_p7 = scmp.eq.s32.totalorder %s173_s8, 0 }
   0xb   : > { %p2233_p8 = por %p193_p5, %p192_p3  ;;  %p244_p9 = scmp.lt.s32.totalorder %s2146_s26, 3 }
   0xc   : > { %s2239_s10 = scalar_select %p174_p7, %s2134_s23, %s176_s30  }
   0xd   : > { %p245_p10 = pnand %p1679_p6, %p244_p9 }
   0xf   : > { %248 = sbr.rel (%p245_p10) target bundleno = 1310 (0x51e), region = 44 }
  0x14   : > { %v337_v0 = vld [vmem:[%s2928_s2] sm:$0x3]  ;;  %vm474_vm0 = vcmask 1041408   ;;  %p283_p11 = scmp.lt.s32.totalorder %s2138_s24, 1  ;;  %vm425_vm1 = vcmask 31744   ;;  %vm710_vm2 = vcmask 1043456  }
  0x15   : > { %1799 = vmatprep.subr.msk.bf16.mxu0 %vm474_vm0, %v337_v0  ;;  %v476_v1 = vsel %vm474_vm0, %v337_v0, 0  ;;  %v2148_v22 = vmov 0   ;;  %v2301_v26 = vld [vmem:[%s2929_s3] ss:$0 sm:$0xff]  ;;  %vm661_vm3 = vcmask 64512   ;;  %s1747_s16 = sshll.u32 %s2138_s24, 7 }
  0x16   : > { %1766 = vmatpush3.bf16.msra.mxu0 %v476_v1  ;;  %s2246_s13 = scalar_select %p283_p11, %s2138_s24, 1  ;;  %749 = vmatprep.mubr.bf16.mxu1 %v2148_v22 }
  0x17   : > { %1857 = vset.pattern.permute.xlu0 %v2148_v22  ;;  %s2150_s8 = smov [#allocation3]  }
  0x18   : > { %s1746_s14 = sshll.u32 %s2246_s13, 7  ;;  %s1745_s18 = sshll.u32 %s2246_s13, 3 }
  0x19   : > { %s2252_s17 = scalar_lea.vmem %s2927_s1, %s1746_s14  ;;  %s2290_s27 = scalar_lea.vmem %s2926_s0, %s1745_s18 }
  0x1a   : > { %v1858_v2 = vld [vmem:[%s2252_s17] sm:$0xff]   ;;  %v1859_v3 = vld [vmem:[%s2252_s17 + $0x8] sm:$0xff]   ;;  %v1860_v4 = vld [vmem:[%s2252_s17 + $0x10] sm:$0xff]   ;;  %s280_s14 = sand.u32 1, %s2130_s22   ;;  %s2074_s11 = sshll.u32 %s2150_s8, 4  ;;  %s2075_s11 = int_to_ptr.vmem [resolvable:$false] %s2074_s11 }
  0x1b   : > { %1767 = vmatprep.mubr.msk.bf16.mxu0 %vm425_vm1, %v1858_v2  ;;  %v1861_v5 = vld [vmem:[%s2252_s17 + $0x18] sm:$0xff]   ;;  %v1862_v6 = vld [vmem:[%s2252_s17 + $0x20] sm:$0xff]   ;;  %v1863_v7 = vld [vmem:[%s2252_s17 + $0x28] sm:$0xff]   ;;  %s1680_s15 = sshll.u32 %s280_s14, 3  ;;  %s1574_s28 = scalar_lea.sflag [#allocation4], %s280_s14 }
  0x1c   : > { %1768 = vmatmul.mubr.msk.bf16.vlgmr.msra.gmra.mxu0 %vm425_vm1, %v1859_v3  ;;  %v1864_v8 = vld [vmem:[%s2252_s17 + $0x30] sm:$0xff]   ;;  %v1865_v9 = vld [vmem:[%s2252_s17 + $0x38] sm:$0xff]   ;;  %v1866_v10 = vld [vmem:[%s2252_s17 + $0x40] sm:$0xff]   ;;  %s2076_s24 = scalar_lea.vmem %s2075_s11, 256 }
  0x1d   : > { %1771 = vmatprep.mubr.msk.bf16.mxu0 %vm425_vm1, %v1860_v4  ;;  %v1867_v11 = vld [vmem:[%s2252_s17 + $0x48] sm:$0xff]   ;;  %v1868_v12 = vld [vmem:[%s2252_s17 + $0x50] sm:$0xff]   ;;  %v1869_v13 = vld [vmem:[%s2252_s17 + $0x58] sm:$0xff]  }
  0x1e   : > { %v1870_v14 = vld [vmem:[%s2252_s17 + $0x60] sm:$0xff]   ;;  %v1871_v15 = vld [vmem:[%s2252_s17 + $0x68] sm:$0xff]   ;;  %v1872_v16 = vld [vmem:[%s2252_s17 + $0x70] sm:$0xff]  }
  0x1f   : > { %v1873_v17 = vld [vmem:[%s2252_s17 + $0x78] sm:$0xff]   ;;  %v655_v18 = vld [vmem:[%s2290_s27] sm:$0xff]  ;;  %s282_s17 = scalar_lea.vmem [#allocation3], %s1680_s15 }
  0x20   : > { %v1719_v19 = vcombine.high %v655_v18, %v655_v18  ;;  %v2293_v20 = vcombine.low %v655_v18, %v655_v18  ;;  %s1588_s18 = sshll.u32 %s282_s17, 4  ;;  %s1589_s18 = int_to_ptr.vmem [resolvable:$true] %s1588_s18 }
  0x21   : > { %s2070_s30 = scalar_lea.vmem %s1589_s18, 128  ;;  %p2077_p1 = scmp.lt.s32.totalorder %s1589_s18, %s2075_s11 }
  0x22   : > { %2969 = vst [vmem:[#allocation6_spill] sm:$0xff] %v2293_v20  ;;  %1720 = vmatprep.subr.msk.bf16.mxu1 %vm710_vm2, %v1719_v19  ;;  %v712_v21 = vsel %vm710_vm2, %v2293_v20, 0  ;;  %p2071_p12 = scmp.ne.s32.totalorder %s1589_s18, %s2070_s30  ;;  %p2078_p2 = scmp.lt.s32.totalorder %s2076_s24, %s2070_s30 }
  0x23   : > { %732 = vmatpush1.bf16.msra.mxu1 %v712_v21 }
  0x24   : > { %1772 = vmatmul.mubr.msk.bf16.gmra.mxu0 %vm425_vm1, %v1861_v5  ;;  %p2072_p13 = pnand %p2071_p12, %p2226_p4  ;;  %p2079_p3 = por %p2078_p2, %p2077_p1 }
  0x25   : > { %1775 = vmatprep.mubr.msk.bf16.mxu0 %vm425_vm1, %v1862_v6 }
  0x26   : > { %p2073_p0 = pneg %p2072_p13 }
  0x28   : > { %p2080_p5 = pnand %p2079_p3, %p2073_p0 }
  0x2c   : > { %1776 = vmatmul.mubr.msk.bf16.gmra.mxu0 %vm425_vm1, %v1863_v7 }
  0x2d   : > { %1779 = vmatprep.mubr.msk.bf16.mxu0 %vm425_vm1, %v1864_v8 }
  0x34   : > { %1780 = vmatmul.mubr.msk.bf16.gmra.mxu0 %vm425_vm1, %v1865_v9 }
  0x35   : > { %1783 = vmatprep.mubr.msk.bf16.mxu0 %vm425_vm1, %v1866_v10 }
  0x3c   : > { %1784 = vmatmul.mubr.msk.bf16.gmra.mxu0 %vm425_vm1, %v1867_v11 }
  0x3d   : > { %1787 = vmatprep.mubr.msk.bf16.mxu0 %vm425_vm1, %v1868_v12 }
  0x44   : > { %1788 = vmatmul.mubr.msk.bf16.gmra.mxu0 %vm425_vm1, %v1869_v13 }
  0x45   : > { %1791 = vmatprep.mubr.msk.bf16.mxu0 %vm425_vm1, %v1870_v14 }
  0x4c   : > { %1792 = vmatmul.mubr.msk.bf16.gmra.mxu0 %vm425_vm1, %v1871_v15 }
  0x4d   : > { %1795 = vmatprep.mubr.msk.bf16.mxu0 %vm425_vm1, %v1872_v16 }
  0x54   : > { %1796 = vmatmul.mubr.msk.bf16.gmra.mxu0 %vm425_vm1, %v1873_v17 }
  0xdc   : > { %v1769_v23 = vpop.f32.mrf.mxu0 }
  0xdd   : > { %v521_v35 = vadd.f32 %v1769_v23, %v2301_v26 }
  0xde   : > { %v512_v24 = vpop.f32.mrf.mxu0 }
  0xdf   : > { %v513_v28 = vadd.f32 %v2301_v26, %v512_v24 }
  0xe0   : > { %v1770_v25 = vpop.f32.mrf.mxu0 }
  0xe1   : > { %v524_v33 = vadd.f32 %v1770_v25, %v2301_v26 }
  0xe2   : > { %v515_v27 = vpop.f32.mrf.mxu0 }
  0xe3   : > { %v516_v29 = vadd.f32 %v2301_v26, %v515_v27  ;;  %v640_v36 = vpack.c.bf16 %v524_v33, %v521_v35 }
  0xe4   : > { %v1773_v30 = vpop.f32.mrf.mxu0 }
  0xe5   : > { %v639_v31 = vpack.c.bf16 %v516_v29, %v513_v28  ;;  %v537_v43 = vadd.f32 %v1773_v30, %v2301_v26 }
  0xe6   : > { %v528_v32 = vpop.f32.mrf.mxu0 }
  0xe7   : > { %1721 = vmatmul.mubr.msk.bf16.vlgmr.msra.gmra.mxu1 %vm661_vm3, %v639_v31  ;;  %v529_v38 = vadd.f32 %v2301_v26, %v528_v32 }
  0xe8   : > { %759 = vmatprep.mubr.bf16.mxu1 %v2148_v22  ;;  %v1774_v34 = vpop.f32.mrf.mxu0 }
  0xe9   : > { %v540_v44 = vadd.f32 %v1774_v34, %v2301_v26 }
  0xea   : > { %v531_v37 = vpop.f32.mrf.mxu0 }
  0xeb   : > { %v532_v39 = vadd.f32 %v2301_v26, %v531_v37  ;;  %v642_v46 = vpack.c.bf16 %v540_v44, %v537_v43 }
  0xec   : > { %v1777_v40 = vpop.f32.mrf.mxu0 }
  0xed   : > { %v641_v41 = vpack.c.bf16 %v532_v39, %v529_v38  ;;  %v553_v53 = vadd.f32 %v1777_v40, %v2301_v26 }
  0xee   : > { %v544_v42 = vpop.f32.mrf.mxu0 }
  0xef   : > { %1722 = vmatmul.mubr.msk.bf16.gmra.mxu1 %vm661_vm3, %v640_v36  ;;  %v545_v48 = vadd.f32 %v2301_v26, %v544_v42 }
  0xf0   : > { %769 = vmatprep.mubr.bf16.mxu1 %v2148_v22  ;;  %v1778_v45 = vpop.f32.mrf.mxu0 }
  0xf1   : > { %v556_v54 = vadd.f32 %v1778_v45, %v2301_v26 }
  0xf2   : > { %v547_v47 = vpop.f32.mrf.mxu0 }
  0xf3   : > { %v548_v49 = vadd.f32 %v2301_v26, %v547_v47  ;;  %v644_v56 = vpack.c.bf16 %v556_v54, %v553_v53 }
  0xf4   : > { %v1781_v50 = vpop.f32.mrf.mxu0 }
  0xf5   : > { %v643_v51 = vpack.c.bf16 %v548_v49, %v545_v48  ;;  %v569_v63 = vadd.f32 %v1781_v50, %v2301_v26 }
  0xf6   : > { %v560_v52 = vpop.f32.mrf.mxu0 }
  0xf7   : > { %1723 = vmatmul.mubr.msk.bf16.gmra.mxu1 %vm661_vm3, %v641_v41  ;;  %v561_v58 = vadd.f32 %v2301_v26, %v560_v52 }
  0xf8   : > { %779 = vmatprep.mubr.bf16.mxu1 %v2148_v22  ;;  %v1782_v55 = vpop.f32.mrf.mxu0 }
  0xf9   : > { %v572_v0 = vadd.f32 %v1782_v55, %v2301_v26 }
  0xfa   : > { %v563_v57 = vpop.f32.mrf.mxu0 }
  0xfb   : > { %v564_v59 = vadd.f32 %v2301_v26, %v563_v57  ;;  %v646_v2 = vpack.c.bf16 %v572_v0, %v569_v63 }
  0xfc   : > { %v1785_v60 = vpop.f32.mrf.mxu0 }
  0xfd   : > { %v645_v61 = vpack.c.bf16 %v564_v59, %v561_v58  ;;  %v585_v9 = vadd.f32 %v1785_v60, %v2301_v26 }
  0xfe   : > { %v576_v62 = vpop.f32.mrf.mxu0 }
  0xff   : > { %1724 = vmatmul.mubr.msk.bf16.gmra.mxu1 %vm661_vm3, %v642_v46  ;;  %v577_v4 = vadd.f32 %v2301_v26, %v576_v62 }
 0x100   : > { %789 = vmatprep.mubr.bf16.mxu1 %v2148_v22  ;;  %v1786_v1 = vpop.f32.mrf.mxu0 }
 0x101   : > { %v588_v10 = vadd.f32 %v1786_v1, %v2301_v26 }
 0x102   : > { %v579_v3 = vpop.f32.mrf.mxu0 }
 0x103   : > { %v580_v5 = vadd.f32 %v2301_v26, %v579_v3  ;;  %v648_v12 = vpack.c.bf16 %v588_v10, %v585_v9 }
 0x104   : > { %v1789_v6 = vpop.f32.mrf.mxu0 }
 0x105   : > { %v647_v7 = vpack.c.bf16 %v580_v5, %v577_v4  ;;  %v601_v19 = vadd.f32 %v1789_v6, %v2301_v26 }
 0x106   : > { %v592_v8 = vpop.f32.mrf.mxu0 }
 0x107   : > { %1725 = vmatmul.mubr.msk.bf16.gmra.mxu1 %vm661_vm3, %v643_v51  ;;  %v593_v14 = vadd.f32 %v2301_v26, %v592_v8 }
 0x108   : > { %799 = vmatprep.mubr.bf16.mxu1 %v2148_v22  ;;  %v1790_v11 = vpop.f32.mrf.mxu0 }
 0x109   : > { %v604_v21 = vadd.f32 %v1790_v11, %v2301_v26 }
 0x10a   : > { %v595_v13 = vpop.f32.mrf.mxu0 }
 0x10b   : > { %v596_v15 = vadd.f32 %v2301_v26, %v595_v13  ;;  %v650_v24 = vpack.c.bf16 %v604_v21, %v601_v19 }
 0x10c   : > { %v1793_v16 = vpop.f32.mrf.mxu0 }
 0x10d   : > { %v649_v17 = vpack.c.bf16 %v596_v15, %v593_v14  ;;  %v617_v32 = vadd.f32 %v1793_v16, %v2301_v26 }
 0x10e   : > { %v608_v18 = vpop.f32.mrf.mxu0 }
 0x10f   : > { %1726 = vmatmul.mubr.msk.bf16.gmra.mxu1 %vm661_vm3, %v644_v56  ;;  %v609_v27 = vadd.f32 %v2301_v26, %v608_v18 }
 0x110   : > { %809 = vmatprep.mubr.bf16.mxu1 %v2148_v22  ;;  %v1794_v23 = vpop.f32.mrf.mxu0 }
 0x111   : > { %v620_v33 = vadd.f32 %v1794_v23, %v2301_v26 }
 0x112   : > { %v611_v25 = vpop.f32.mrf.mxu0 }
 0x113   : > { %v612_v28 = vadd.f32 %v2301_v26, %v611_v25  ;;  %v652_v35 = vpack.c.bf16 %v620_v33, %v617_v32 }
 0x114   : > { %v1797_v29 = vpop.f32.mrf.mxu0 }
 0x115   : > { %v651_v30 = vpack.c.bf16 %v612_v28, %v609_v27  ;;  %v633_v40 = vadd.f32 %v1797_v29, %v2301_v26 }
 0x116   : > { %v624_v31 = vpop.f32.mrf.mxu0 }
 0x117   : > { %1727 = vmatmul.mubr.msk.bf16.gmra.mxu1 %vm661_vm3, %v645_v61  ;;  %v625_v37 = vadd.f32 %v2301_v26, %v624_v31 }
 0x118   : > { %819 = vmatprep.mubr.bf16.mxu1 %v2148_v22  ;;  %v1798_v34 = vpop.f32.mrf.mxu0 }
 0x119   : > { %v636_v41 = vadd.f32 %v1798_v34, %v2301_v26 }
 0x11a   : > { %v627_v36 = vpop.f32.mrf.mxu0 }
 0x11b   : > { %v628_v38 = vadd.f32 %v2301_v26, %v627_v36  ;;  %v654_v42 = vpack.c.bf16 %v636_v41, %v633_v40 }
 0x11d   : > { %v653_v39 = vpack.c.bf16 %v628_v38, %v625_v37 }
 0x11f   : > { %1728 = vmatmul.mubr.msk.bf16.gmra.mxu1 %vm661_vm3, %v646_v2 }
 0x120   : > { %829 = vmatprep.mubr.bf16.mxu1 %v2148_v22 }
 0x127   : > { %1729 = vmatmul.mubr.msk.bf16.gmra.mxu1 %vm661_vm3, %v647_v7 }
 0x128   : > { %839 = vmatprep.mubr.bf16.mxu1 %v2148_v22 }
 0x12f   : > { %1730 = vmatmul.mubr.msk.bf16.gmra.mxu1 %vm661_vm3, %v648_v12 }
 0x130   : > { %849 = vmatprep.mubr.bf16.mxu1 %v2148_v22 }
 0x137   : > { %1731 = vmatmul.mubr.msk.bf16.gmra.mxu1 %vm661_vm3, %v649_v17 }
 0x138   : > { %859 = vmatprep.mubr.bf16.mxu1 %v2148_v22 }
 0x13f   : > { %1732 = vmatmul.mubr.msk.bf16.gmra.mxu1 %vm661_vm3, %v650_v24 }
 0x140   : > { %869 = vmatprep.mubr.bf16.mxu1 %v2148_v22 }
 0x147   : > { %1733 = vmatmul.mubr.msk.bf16.gmra.mxu1 %vm661_vm3, %v651_v30 }
 0x148   : > { %879 = vmatprep.mubr.bf16.mxu1 %v2148_v22 }
 0x14f   : > { %1734 = vmatmul.mubr.msk.bf16.gmra.mxu1 %vm661_vm3, %v652_v35 }
 0x150   : > { %889 = vmatprep.mubr.bf16.mxu1 %v2148_v22 }
 0x157   : > { %1735 = vmatmul.mubr.msk.bf16.gmra.mxu1 %vm661_vm3, %v653_v39 }
 0x158   : > { %899 = vmatprep.mubr.bf16.mxu1 %v2148_v22 }
 0x15f   : > { %1736 = vmatmul.mubr.msk.bf16.gmra.mxu1 %vm661_vm3, %v654_v42 }
 0x1a7   : > { %v2366_v43 = vpop.f32.mrf.mxu1 }
 0x1a8   : > { %2970 = vst [vmem:[#allocation7_spill] sm:$0xff] %v2366_v43 }
 0x1a9   : > { %v2368_v44 = vpop.f32.mrf.mxu1 }
 0x1aa   : > { %2971 = vst [vmem:[#allocation8_spill] sm:$0xff] %v2368_v44  ;;  %v910_v39 = vmax.f32 %v2366_v43, %v2368_v44 }
 0x1ab   : > { %v2370_v45 = vpop.f32.mrf.mxu1 }
 0x1ac   : > { %2972 = vst [vmem:[#allocation9_spill] sm:$0xff] %v2370_v45 }
 0x1ad   : > { %v2372_v46 = vpop.f32.mrf.mxu1 }
 0x1ae   : > { %2973 = vst [vmem:[#allocation10_spill] sm:$0xff] %v2372_v46  ;;  %v913_v32 = vmax.f32 %v2370_v45, %v2372_v46 }
 0x1af   : > { %v2374_v47 = vpop.f32.mrf.mxu1 }
 0x1b1   : > { %v2376_v48 = vpop.f32.mrf.mxu1 }
 0x1b2   : > { %2974 = vst [vmem:[#allocation11_spill] sm:$0xff] %v2376_v48  ;;  %v916_v36 = vmax.f32 %v2374_v47, %v2376_v48 }
 0x1b3   : > { %v2378_v22 = vpop.f32.mrf.mxu1 }
 0x1b5   : > { %v2380_v49 = vpop.f32.mrf.mxu1 }
 0x1b6   : > { %v919_v28 = vmax.f32 %v2378_v22, %v2380_v49 }
 0x1b7   : > { %v2382_v26 = vpop.f32.mrf.mxu1 }
 0x1b9   : > { %v2384_v50 = vpop.f32.mrf.mxu1 }
 0x1ba   : > { %v922_v33 = vmax.f32 %v2382_v26, %v2384_v50 }
 0x1bb   : > { %v2386_v51 = vpop.f32.mrf.mxu1 }
 0x1bd   : > { %v2388_v52 = vpop.f32.mrf.mxu1 }
 0x1be   : > { %v925_v23 = vmax.f32 %v2386_v51, %v2388_v52 }
 0x1bf   : > { %v2390_v53 = vpop.f32.mrf.mxu1 }
 0x1c1   : > { %v2392_v54 = vpop.f32.mrf.mxu1 }
 0x1c2   : > { %v928_v29 = vmax.f32 %v2390_v53, %v2392_v54 }
 0x1c3   : > { %v2394_v55 = vpop.f32.mrf.mxu1 }
 0x1c5   : > { %v2396_v56 = vpop.f32.mrf.mxu1 }
 0x1c6   : > { %v931_v17 = vmax.f32 %v2394_v55, %v2396_v56 }
 0x1c7   : > { %v2398_v57 = vpop.f32.mrf.mxu1 }
 0x1c9   : > { %v2400_v58 = vpop.f32.mrf.mxu1 }
 0x1ca   : > { %v934_v24 = vmax.f32 %v2398_v57, %v2400_v58 }
 0x1cb   : > { %v2402_v59 = vpop.f32.mrf.mxu1 }
 0x1cd   : > { %v2404_v60 = vpop.f32.mrf.mxu1 }
 0x1ce   : > { %v937_v13 = vmax.f32 %v2402_v59, %v2404_v60 }
 0x1cf   : > { %v2406_v61 = vpop.f32.mrf.mxu1 }
 0x1d1   : > { %v2408_v62 = vpop.f32.mrf.mxu1 }
 0x1d2   : > { %v940_v18 = vmax.f32 %v2406_v61, %v2408_v62 }
 0x1d3   : > { %v2410_v63 = vpop.f32.mrf.mxu1 }
 0x1d5   : > { %v2412_v0 = vpop.f32.mrf.mxu1 }
 0x1d6   : > { %v943_v9 = vmax.f32 %v2410_v63, %v2412_v0 }
 0x1d7   : > { %v2414_v1 = vpop.f32.mrf.mxu1 }
 0x1d9   : > { %v2416_v2 = vpop.f32.mrf.mxu1 }
 0x1da   : > { %v946_v3 = vmax.f32 %v2414_v1, %v2416_v2 }
 0x1db   : > { %v2420_v4 = vpop.f32.mrf.mxu1 }
 0x1dc   : > { %947 = vmax.xlane.f32.xlu1 %v946_v3 }
 0x1dd   : > { %v2422_v5 = vpop.f32.mrf.mxu1 }
 0x1de   : > { %v949_v6 = vmax.f32 %v2420_v4, %v2422_v5 }
 0x1df   : > { %v2426_v7 = vpop.f32.mrf.mxu1 }
 0x1e0   : > { %950 = vmax.xlane.f32.xlu1 %v949_v6 }
 0x1e1   : > { %v2428_v8 = vpop.f32.mrf.mxu1 }
 0x1e2   : > { %v952_v10 = vmax.f32 %v2426_v7, %v2428_v8 }
 0x1e3   : > { %v2434_v11 = vpop.f32.mrf.mxu1 }
 0x1e4   : > { %944 = vmax.xlane.f32.xlu1 %v943_v9  ;;  %953 = vmax.xlane.f32.xlu0 %v952_v10 }
 0x1e5   : > { %v2436_v12 = vpop.f32.mrf.mxu1 }
 0x1e6   : > { %v955_v14 = vmax.f32 %v2434_v11, %v2436_v12 }
 0x1e7   : > { %v2442_v15 = vpop.f32.mrf.mxu1 }
 0x1e8   : > { %2975 = vst [vmem:[#allocation12_spill] sm:$0xff] %v2442_v15  ;;  %938 = vmax.xlane.f32.xlu1 %v937_v13  ;;  %956 = vmax.xlane.f32.xlu0 %v955_v14 }
 0x1e9   : > { %v2444_v16 = vpop.f32.mrf.mxu1 }
 0x1ea   : > { %2976 = vst [vmem:[#allocation13_spill] sm:$0xff] %v2444_v16 }
 0x1eb   : > { %v2450_v19 = vpop.f32.mrf.mxu1 }
 0x1ec   : > { %2977 = vst [vmem:[#allocation14_spill] sm:$0xff] %v2450_v19  ;;  %932 = vmax.xlane.f32.xlu1 %v931_v17  ;;  %941 = vmax.xlane.f32.xlu0 %v940_v18 }
 0x1ed   : > { %v2452_v21 = vpop.f32.mrf.mxu1 }
 0x1ee   : > { %2978 = vst [vmem:[#allocation15_spill] sm:$0xff] %v2452_v21 }
 0x1ef   : > { %v2458_v25 = vpop.f32.mrf.mxu1 }
 0x1f0   : > { %926 = vmax.xlane.f32.xlu1 %v925_v23  ;;  %935 = vmax.xlane.f32.xlu0 %v934_v24 }
 0x1f1   : > { %v2460_v27 = vpop.f32.mrf.mxu1 }
 0x1f2   : > { %2979 = vst [vmem:[#allocation16_spill] sm:$0xff] %v2460_v27 }
 0x1f3   : > { %v2466_v30 = vpop.f32.mrf.mxu1 }
 0x1f4   : > { %2980 = vst [vmem:[#allocation17_spill] sm:$0xff] %v2466_v30  ;;  %920 = vmax.xlane.f32.xlu1 %v919_v28  ;;  %929 = vmax.xlane.f32.xlu0 %v928_v29 }
 0x1f5   : > { %v2468_v31 = vpop.f32.mrf.mxu1 }
 0x1f6   : > { %2981 = vst [vmem:[#allocation18_spill] sm:$0xff] %v2468_v31 }
 0x1f7   : > { %v2474_v34 = vpop.f32.mrf.mxu1 }
 0x1f8   : > { %914 = vmax.xlane.f32.xlu1 %v913_v32  ;;  %923 = vmax.xlane.f32.xlu0 %v922_v33 }
 0x1f9   : > { %v2476_v35 = vpop.f32.mrf.mxu1 }
 0x1fb   : > { %v2480_v37 = vpop.f32.mrf.mxu1 }
 0x1fc   : > { %2982 = vst [vmem:[#allocation19_spill] sm:$0xff] %v2480_v37  ;;  %917 = vmax.xlane.f32.xlu0 %v916_v36 }
 0x1fd   : > { %v2482_v38 = vpop.f32.mrf.mxu1 }
 0x1fe   : > { %2983 = vst [vmem:[#allocation20_spill] sm:$0xff] %v2482_v38 }
 0x1ff   : > { %v2486_v40 = vpop.f32.mrf.mxu1 }
 0x200   : > { %911 = vmax.xlane.f32.xlu0 %v910_v39 }
 0x201   : > { %v2488_v41 = vpop.f32.mrf.mxu1 }
 0x203   : > { %v2490_v42 = vpop.f32.mrf.mxu1 }
 0x205   : > { %v2492_v3 = vpop.f32.mrf.mxu1 }
 0x206   : > { %2984 = vst [vmem:[#allocation21_spill] sm:$0xff] %v2492_v3 }
 0x207   : > { %v2494_v6 = vpop.f32.mrf.mxu1 }
 0x209   : > { %v2496_v9 = vpop.f32.mrf.mxu1 }
 0x20b   : > { %v2498_v10 = vpop.f32.mrf.mxu1 }
 0x20d   : > { %v2500_v13 = vpop.f32.mrf.mxu1 }
 0x20f   : > { %v2502_v14 = vpop.f32.mrf.mxu1 }
 0x211   : > { %v2504_v17 = vpop.f32.mrf.mxu1 }
 0x212   : > { %v988_v45 = vmax.f32 %v2502_v14, %v2504_v17 }
 0x213   : > { %v2506_v18 = vpop.f32.mrf.mxu1 }
 0x215   : > { %v2508_v23 = vpop.f32.mrf.mxu1 }
 0x217   : > { %v2510_v24 = vpop.f32.mrf.mxu1 }
 0x219   : > { %v2512_v28 = vpop.f32.mrf.mxu1 }
 0x21a   : > { %v994_v43 = vmax.f32 %v2510_v24, %v2512_v28 }
 0x21b   : > { %v2514_v29 = vpop.f32.mrf.mxu1 }
 0x21d   : > { %v2516_v32 = vpop.f32.mrf.mxu1 }
 0x21e   : > { %v997_v48 = vmax.f32 %v2514_v29, %v2516_v32 }
 0x21f   : > { %v2518_v33 = vpop.f32.mrf.mxu1 }
 0x221   : > { %v2520_v36 = vpop.f32.mrf.mxu1 }
 0x222   : > { %2985 = vst [vmem:[#allocation22_spill] sm:$0xff] %v2520_v36  ;;  %v1000_v39 = vmax.f32 %v2518_v33, %v2520_v36  ;;  %v991_v36 = vmax.f32 %v2506_v18, %v2508_v23 }
 0x223   : > { %v2524_v20 = vpop.f32.mrf.mxu1 }
 0x224   : > { %1001 = vmax.xlane.f32.xlu0 %v1000_v39  ;;  %v982_v39 = vmax.f32 %v2494_v6, %v2496_v9 }
 0x225   : > { %v2526_v46 = vpop.f32.mrf.mxu1 }
 0x226   : > { %v1003_v44 = vmax.f32 %v2524_v20, %v2526_v46 }
 0x228   : > { %995 = vmax.xlane.f32.xlu0 %v994_v43  ;;  %1004 = vmax.xlane.f32.xlu1 %v1003_v44  ;;  %v976_v43 = vmax.f32 %v2486_v40, %v2488_v41  ;;  %v985_v44 = vmax.f32 %v2498_v10, %v2500_v13 }
 0x22c   : > { %989 = vmax.xlane.f32.xlu0 %v988_v45  ;;  %998 = vmax.xlane.f32.xlu1 %v997_v48  ;;  %v970_v45 = vmax.f32 %v2474_v34, %v2476_v35  ;;  %v979_v48 = vmax.f32 %v2490_v42, %v2492_v3 }
 0x230   : > { %983 = vmax.xlane.f32.xlu0 %v982_v39  ;;  %992 = vmax.xlane.f32.xlu1 %v991_v36  ;;  %v964_v39 = vmax.f32 %v2458_v25, %v2460_v27  ;;  %v973_v36 = vmax.f32 %v2480_v37, %v2482_v38 }
 0x234   : > { %977 = vmax.xlane.f32.xlu0 %v976_v43  ;;  %986 = vmax.xlane.f32.xlu1 %v985_v44  ;;  %v958_v43 = vmax.f32 %v2442_v15, %v2444_v16  ;;  %v967_v44 = vmax.f32 %v2466_v30, %v2468_v31 }
 0x238   : > { %971 = vmax.xlane.f32.xlu0 %v970_v45  ;;  %980 = vmax.xlane.f32.xlu1 %v979_v48  ;;  %v961_v45 = vmax.f32 %v2450_v19, %v2452_v21 }
 0x23c   : > { %965 = vmax.xlane.f32.xlu0 %v964_v39  ;;  %974 = vmax.xlane.f32.xlu1 %v973_v36 }
 0x240   : > { %959 = vmax.xlane.f32.xlu0 %v958_v43  ;;  %968 = vmax.xlane.f32.xlu1 %v967_v44 }
 0x244   : > { %962 = vmax.xlane.f32.xlu1 %v961_v45 }
 0x265   : > { %v948_v48 = vpop.xlane.xlu1 %947 }
 0x266   : > { %v1030_v27 = vsub.f32 %v2414_v1, %v948_v48  ;;  %v1031_v38 = vsub.f32 %v2416_v2, %v948_v48 }
 0x268   : > { %v1118_v37 = vmul.f32 1.442695, %v1030_v27  ;;  %v1120_v31 = vmul.f32 1.442695, %v1031_v38 }
 0x269   : > { %v951_v3 = vpop.xlane.xlu1 %950 }
 0x26a   : > { %v1032_v16 = vsub.f32 %v2420_v4, %v951_v3  ;;  %v1033_v43 = vsub.f32 %v2422_v5, %v951_v3  ;;  %1877 = vpow2.f32 %v1118_v37 }
 0x26b   : > { %1879 = vpow2.f32 %v1120_v31 }
 0x26c   : > { %v1122_v1 = vmul.f32 1.442695, %v1032_v16  ;;  %v1124_v27 = vmul.f32 1.442695, %v1033_v43 }
 0x26d   : > { %v945_v39 = vpop.xlane.xlu1 %944  ;;  %v954_v36 = vpop.xlane.xlu0 %953 }
 0x26e   : > { %v1034_v15 = vsub.f32 %v2426_v7, %v954_v36  ;;  %v1035_v44 = vsub.f32 %v2428_v8, %v954_v36  ;;  %v1028_v2 = vsub.f32 %v2410_v63, %v945_v39  ;;  %v1029_v4 = vsub.f32 %v2412_v0, %v945_v39 }
 0x270   : > { %v1126_v21 = vmul.f32 1.442695, %v1034_v15  ;;  %v1128_v45 = vmul.f32 1.442695, %v1035_v44  ;;  %v1114_v3 = vmul.f32 1.442695, %v1028_v2 }
 0x271   : > { %v939_v19 = vpop.xlane.xlu1 %938  ;;  %v957_v30 = vpop.xlane.xlu0 %956 }
 0x272   : > { %v1036_v48 = vsub.f32 %v2434_v11, %v957_v30  ;;  %v1037_v7 = vsub.f32 %v2436_v12, %v957_v30  ;;  %1881 = vpow2.f32 %v1126_v21  ;;  %v1024_v16 = vsub.f32 %v2402_v59, %v939_v19 }
 0x273   : > { %1883 = vpow2.f32 %v1128_v45  ;;  %v1116_v11 = vmul.f32 1.442695, %v1029_v4  ;;  %v1025_v31 = vsub.f32 %v2404_v60, %v939_v19 }
 0x274   : > { %v1130_v5 = vmul.f32 1.442695, %v1036_v48  ;;  %v1132_v8 = vmul.f32 1.442695, %v1037_v7  ;;  %1885 = vpow2.f32 %v1122_v1  ;;  %v1106_v37 = vmul.f32 1.442695, %v1024_v16 }
 0x275   : > { %v933_v15 = vpop.xlane.xlu1 %932  ;;  %v942_v38 = vpop.xlane.xlu0 %941  ;;  %1887 = vpow2.f32 %v1124_v27  ;;  %v1108_v59 = vmul.f32 1.442695, %v1025_v31 }
 0x276   : > { %v1026_v63 = vsub.f32 %v2406_v61, %v942_v38  ;;  %v1027_v0 = vsub.f32 %v2408_v62, %v942_v38  ;;  %1889 = vpow2.f32 %v1130_v5  ;;  %v1020_v39 = vsub.f32 %v2394_v55, %v933_v15 }
 0x277   : > { %1891 = vpow2.f32 %v1132_v8  ;;  %v1021_v61 = vsub.f32 %v2396_v56, %v933_v15  ;;  %v2578_v2 = vpop.eup %1877 }
 0x278   : > { %v1110_v12 = vmul.f32 1.442695, %v1026_v63  ;;  %v1112_v21 = vmul.f32 1.442695, %v1027_v0  ;;  %1893 = vpow2.f32 %v1114_v3  ;;  %v1098_v45 = vmul.f32 1.442695, %v1020_v39 }
 0x279   : > { %v936_v30 = vpop.xlane.xlu0 %935  ;;  %1895 = vpow2.f32 %v1116_v11  ;;  %v927_v43 = vpop.xlane.xlu1 %926 }
 0x27a   : > { %v1022_v36 = vsub.f32 %v2398_v57, %v936_v30  ;;  %v1023_v60 = vsub.f32 %v2400_v58, %v936_v30  ;;  %1897 = vpow2.f32 %v1110_v12  ;;  %v1016_v1 = vsub.f32 %v2386_v51, %v927_v43  ;;  %v2582_v58 = vpop.eup %1879  ;;  %v2986_v30 = vld [vmem:[#allocation11_spill] sm:$0xff] }
 0x27b   : > { %1899 = vpow2.f32 %v1112_v21  ;;  %v1100_v57 = vmul.f32 1.442695, %v1021_v61  ;;  %v1017_v56 = vsub.f32 %v2388_v52, %v927_v43 }
 0x27c   : > { %v1102_v62 = vmul.f32 1.442695, %v1022_v36  ;;  %v1104_v19 = vmul.f32 1.442695, %v1023_v60  ;;  %1901 = vpow2.f32 %v1106_v37  ;;  %v1234_v36 = vadd.f32 %v2582_v58, %v2578_v2 }
 0x27d   : > { %v930_v44 = vpop.xlane.xlu0 %929  ;;  %1903 = vpow2.f32 %v1108_v59  ;;  %v921_v7 = vpop.xlane.xlu1 %920  ;;  %v1092_v52 = vmul.f32 1.442695, %v1017_v56  ;;  %v2989_v56 = vld [vmem:[#allocation8_spill] sm:$0xff] }
 0x27e   : > { %v1018_v55 = vsub.f32 %v2390_v53, %v930_v44  ;;  %v1019_v48 = vsub.f32 %v2392_v54, %v930_v44  ;;  %1905 = vpow2.f32 %v1102_v62  ;;  %v1090_v53 = vmul.f32 1.442695, %v1016_v1 }
 0x27f   : > { %v2584_v4 = vpop.eup %1881  ;;  %1907 = vpow2.f32 %v1104_v19  ;;  %v1012_v63 = vsub.f32 %v2378_v22, %v921_v7  ;;  %v1013_v0 = vsub.f32 %v2380_v49, %v921_v7  ;;  %v2990_v7 = vld [vmem:[#allocation10_spill] sm:$0xff] }
 0x280   : > { %v1094_v27 = vmul.f32 1.442695, %v1018_v55  ;;  %v1096_v5 = vmul.f32 1.442695, %v1019_v48  ;;  %v2586_v8 = vpop.eup %1883  ;;  %1909 = vpow2.f32 %v1098_v45  ;;  %v2987_v45 = vld [vmem:[#allocation9_spill] sm:$0xff]  ;;  %v2988_v55 = vld [vmem:[#allocation7_spill] sm:$0xff] }
 0x281   : > { %v924_v51 = vpop.xlane.xlu0 %923  ;;  %v2589_v38 = vpop.eup %1885  ;;  %1911 = vpow2.f32 %v1100_v57  ;;  %v1240_v3 = vadd.f32 %v2586_v8, %v2584_v4  ;;  %v1082_v61 = vmul.f32 1.442695, %v1012_v63 }
 0x282   : > { %v1014_v15 = vsub.f32 %v2382_v26, %v924_v51  ;;  %v1015_v54 = vsub.f32 %v2384_v50, %v924_v51  ;;  %v2594_v16 = vpop.eup %1887  ;;  %1913 = vpow2.f32 %v1094_v27  ;;  %v915_v22 = vpop.xlane.xlu1 %914 }
 0x283   : > { %v2597_v31 = vpop.eup %1889  ;;  %1915 = vpow2.f32 %v1096_v5  ;;  %1241 = vadd.xlane.f32.xlu0 %v1240_v3  ;;  %v1008_v1 = vsub.f32 %v2987_v45, %v915_v22  ;;  %v1009_v5 = vsub.f32 %v2990_v7, %v915_v22 }
 0x284   : > { %v1086_v11 = vmul.f32 1.442695, %v1014_v15  ;;  %v1088_v26 = vmul.f32 1.442695, %v1015_v54  ;;  %v2600_v21 = vpop.eup %1891  ;;  %1917 = vpow2.f32 %v1090_v53  ;;  %v1237_v53 = vadd.f32 %v2594_v16, %v2589_v38 }
 0x285   : > { %v918_v12 = vpop.xlane.xlu0 %917  ;;  %v2604_v39 = vpop.eup %1893  ;;  %1919 = vpow2.f32 %v1092_v52  ;;  %v1243_v49 = vadd.f32 %v2600_v21, %v2597_v31 }
 0x286   : > { %v1010_v50 = vsub.f32 %v2374_v47, %v918_v12  ;;  %v1011_v37 = vsub.f32 %v2986_v30, %v918_v12  ;;  %v2610_v59 = vpop.eup %1895  ;;  %1921 = vpow2.f32 %v1086_v11  ;;  %v1084_v47 = vmul.f32 1.442695, %v1013_v0 }
 0x287   : > { %v2612_v62 = vpop.eup %1897  ;;  %1923 = vpow2.f32 %v1088_v26  ;;  %1235 = vadd.xlane.f32.xlu0 %v1234_v36  ;;  %1244 = vadd.xlane.f32.xlu1 %v1243_v49  ;;  %v1074_v11 = vmul.f32 1.442695, %v1008_v1  ;;  %v1076_v26 = vmul.f32 1.442695, %v1009_v5 }
 0x288   : > { %v1078_v43 = vmul.f32 1.442695, %v1010_v50  ;;  %v1080_v60 = vmul.f32 1.442695, %v1011_v37  ;;  %v2614_v44 = vpop.eup %1899  ;;  %v1231_v50 = vadd.f32 %v2610_v59, %v2604_v39 }
 0x289   : > { %v912_v19 = vpop.xlane.xlu0 %911  ;;  %v2619_v27 = vpop.eup %1901  ;;  %v1228_v51 = vadd.f32 %v2614_v44, %v2612_v62 }
 0x28a   : > { %1925 = vpow2.f32 %v1078_v43  ;;  %v1006_v57 = vsub.f32 %v2988_v55, %v912_v19  ;;  %v1007_v48 = vsub.f32 %v2989_v56, %v912_v19  ;;  %v2626_v15 = vpop.eup %1903 }
 0x28b   : > { %1927 = vpow2.f32 %v1080_v60  ;;  %v2628_v3 = vpop.eup %1905  ;;  %1229 = vadd.xlane.f32.xlu0 %v1228_v51  ;;  %1238 = vadd.xlane.f32.xlu1 %v1237_v53 }
 0x28c   : > { %1929 = vpow2.f32 %v1082_v61  ;;  %v1070_v52 = vmul.f32 1.442695, %v1006_v57  ;;  %v1072_v54 = vmul.f32 1.442695, %v1007_v48  ;;  %v2630_v63 = vpop.eup %1907  ;;  %v1225_v61 = vadd.f32 %v2626_v15, %v2619_v27 }
 0x28d   : > { %1931 = vpow2.f32 %v1084_v47  ;;  %v2632_v0 = vpop.eup %1909  ;;  %v1222_v12 = vadd.f32 %v2630_v63, %v2628_v3 }
 0x28e   : > { %1933 = vpow2.f32 %v1070_v52  ;;  %v2638_v30 = vpop.eup %1911 }
 0x28f   : > { %1935 = vpow2.f32 %v1072_v54  ;;  %v2640_v37 = vpop.eup %1913  ;;  %1223 = vadd.xlane.f32.xlu0 %v1222_v12  ;;  %1232 = vadd.xlane.f32.xlu1 %v1231_v50  ;;  %v1219_v1 = vadd.f32 %v2638_v30, %v2632_v0 }
 0x290   : > { %v2642_v22 = vpop.eup %1915  ;;  %1937 = vpow2.f32 %v1074_v11 }
 0x291   : > { %v2644_v36 = vpop.eup %1917  ;;  %1939 = vpow2.f32 %v1076_v26  ;;  %v1216_v49 = vadd.f32 %v2642_v22, %v2640_v37 }
 0x292   : > { %v2650_v43 = vpop.eup %1919 }
 0x293   : > { %v2652_v60 = vpop.eup %1921  ;;  %1217 = vadd.xlane.f32.xlu0 %v1216_v49  ;;  %1226 = vadd.xlane.f32.xlu1 %v1225_v61  ;;  %v1213_v5 = vadd.f32 %v2650_v43, %v2644_v36  ;;  %v2996_v49 = vld [vmem:[#allocation22_spill] sm:$0xff] }
 0x294   : > { %v2654_v47 = vpop.eup %1923 }
 0x295   : > { %v1210_v45 = vadd.f32 %v2654_v47, %v2652_v60 }
 0x297   : > { %v2656_v19 = vpop.eup %1925  ;;  %1211 = vadd.xlane.f32.xlu0 %v1210_v45  ;;  %1220 = vadd.xlane.f32.xlu1 %v1219_v1 }
 0x298   : > { %v2662_v55 = vpop.eup %1927 }
 0x299   : > { %v2664_v57 = vpop.eup %1929  ;;  %v1204_v56 = vadd.f32 %v2662_v55, %v2656_v19 }
 0x29a   : > { %2991 = vst [vmem:[#allocation11_spill] sm:$0xff] %v2664_v57  ;;  %v2668_v48 = vpop.eup %1931 }
 0x29b   : > { %v2670_v7 = vpop.eup %1933  ;;  %1205 = vadd.xlane.f32.xlu0 %v1204_v56  ;;  %1214 = vadd.xlane.f32.xlu1 %v1213_v5  ;;  %v1207_v54 = vadd.f32 %v2668_v48, %v2664_v57 }
 0x29c   : > { %2992 = vst [vmem:[#allocation9_spill] sm:$0xff] %v2670_v7  ;;  %v2674_v51 = vpop.eup %1935 }
 0x29d   : > { %2993 = vst [vmem:[#allocation7_spill] sm:$0xff] %v2674_v51  ;;  %v1198_v53 = vadd.f32 %v2674_v51, %v2670_v7  ;;  %v2678_v52 = vpop.eup %1937 }
 0x29e   : > { %2994 = vst [vmem:[#allocation8_spill] sm:$0xff] %v2678_v52  ;;  %v2682_v11 = vpop.eup %1939 }
 0x29f   : > { %2995 = vst [vmem:[#allocation10_spill] sm:$0xff] %v2682_v11  ;;  %1199 = vadd.xlane.f32.xlu0 %v1198_v53  ;;  %1208 = vadd.xlane.f32.xlu1 %v1207_v54  ;;  %v1201_v26 = vadd.f32 %v2682_v11, %v2678_v52 }
 0x2a3   : > { %1202 = vadd.xlane.f32.xlu1 %v1201_v26 }
 0x2ad   : > { %v1002_v12 = vpop.xlane.xlu0 %1001 }
 0x2ae   : > { %v1066_v50 = vsub.f32 %v2518_v33, %v1002_v12  ;;  %v1067_v61 = vsub.f32 %v2996_v49, %v1002_v12 }
 0x2b0   : > { %v1190_v45 = vmul.f32 1.442695, %v1066_v50  ;;  %v1192_v1 = vmul.f32 1.442695, %v1067_v61 }
 0x2b1   : > { %v996_v56 = vpop.xlane.xlu0 %995  ;;  %v1005_v5 = vpop.xlane.xlu1 %1004 }
 0x2b2   : > { %1941 = vpow2.f32 %v1190_v45  ;;  %v1062_v7 = vsub.f32 %v2510_v24, %v996_v56  ;;  %v1063_v51 = vsub.f32 %v2512_v28, %v996_v56  ;;  %v1068_v53 = vsub.f32 %v2524_v20, %v1005_v5 }
 0x2b3   : > { %1943 = vpow2.f32 %v1192_v1  ;;  %v1069_v54 = vsub.f32 %v2526_v46, %v1005_v5 }
 0x2b4   : > { %v1182_v26 = vmul.f32 1.442695, %v1062_v7  ;;  %v1184_v52 = vmul.f32 1.442695, %v1063_v51  ;;  %v1194_v11 = vmul.f32 1.442695, %v1068_v53 }
 0x2b5   : > { %v1196_v33 = vmul.f32 1.442695, %v1069_v54  ;;  %v990_v57 = vpop.xlane.xlu0 %989  ;;  %v999_v12 = vpop.xlane.xlu1 %998 }
 0x2b6   : > { %1945 = vpow2.f32 %v1182_v26  ;;  %v1058_v50 = vsub.f32 %v2502_v14, %v990_v57  ;;  %v1059_v49 = vsub.f32 %v2504_v17, %v990_v57  ;;  %v1064_v24 = vsub.f32 %v2514_v29, %v999_v12 }
 0x2b7   : > { %1947 = vpow2.f32 %v1184_v52  ;;  %v1065_v28 = vsub.f32 %v2516_v32, %v999_v12 }
 0x2b8   : > { %1949 = vpow2.f32 %v1194_v11  ;;  %v1174_v20 = vmul.f32 1.442695, %v1058_v50  ;;  %v1176_v61 = vmul.f32 1.442695, %v1059_v49  ;;  %v1186_v46 = vmul.f32 1.442695, %v1064_v24 }
 0x2b9   : > { %1951 = vpow2.f32 %v1196_v33  ;;  %v1188_v7 = vmul.f32 1.442695, %v1065_v28  ;;  %v984_v51 = vpop.xlane.xlu0 %983  ;;  %v993_v45 = vpop.xlane.xlu1 %992 }
 0x2ba   : > { %1953 = vpow2.f32 %v1174_v20  ;;  %v1054_v1 = vsub.f32 %v2494_v6, %v984_v51  ;;  %v1055_v14 = vsub.f32 %v2496_v9, %v984_v51  ;;  %v1060_v17 = vsub.f32 %v2506_v18, %v993_v45  ;;  %v2997_v20 = vld [vmem:[#allocation21_spill] sm:$0xff] }
 0x2bb   : > { %1955 = vpow2.f32 %v1176_v61  ;;  %v1061_v29 = vsub.f32 %v2508_v23, %v993_v45 }
 0x2bc   : > { %1957 = vpow2.f32 %v1186_v46  ;;  %v1166_v32 = vmul.f32 1.442695, %v1054_v1  ;;  %v1168_v57 = vmul.f32 1.442695, %v1055_v14  ;;  %v1178_v52 = vmul.f32 1.442695, %v1060_v17 }
 0x2bd   : > { %1959 = vpow2.f32 %v1188_v7  ;;  %v1180_v11 = vmul.f32 1.442695, %v1061_v29  ;;  %v978_v56 = vpop.xlane.xlu0 %977  ;;  %v987_v5 = vpop.xlane.xlu1 %986 }
 0x2be   : > { %1961 = vpow2.f32 %v1166_v32  ;;  %v1050_v53 = vsub.f32 %v2486_v40, %v978_v56  ;;  %v1051_v6 = vsub.f32 %v2488_v41, %v978_v56  ;;  %v1056_v9 = vsub.f32 %v2498_v10, %v987_v5  ;;  %v2998_v32 = vld [vmem:[#allocation16_spill] sm:$0xff] }
 0x2bf   : > { %v2703_v54 = vpop.eup %1941  ;;  %1963 = vpow2.f32 %v1168_v57  ;;  %v1057_v18 = vsub.f32 %v2500_v13, %v987_v5  ;;  %v3000_v5 = vld [vmem:[#allocation20_spill] sm:$0xff] }
 0x2c0   : > { %v2706_v23 = vpop.eup %1943  ;;  %1965 = vpow2.f32 %v1178_v52  ;;  %v1158_v26 = vmul.f32 1.442695, %v1050_v53  ;;  %v1160_v33 = vmul.f32 1.442695, %v1051_v6  ;;  %v1170_v12 = vmul.f32 1.442695, %v1056_v9 }
 0x2c1   : > { %1967 = vpow2.f32 %v1180_v11  ;;  %v1172_v50 = vmul.f32 1.442695, %v1057_v18  ;;  %v972_v49 = vpop.xlane.xlu0 %971  ;;  %v981_v24 = vpop.xlane.xlu1 %980  ;;  %v1288_v40 = vadd.f32 %v2706_v23, %v2703_v54  ;;  %v2999_v52 = vld [vmem:[#allocation19_spill] sm:$0xff] }
 0x2c2   : > { %1969 = vpow2.f32 %v1158_v26  ;;  %v1046_v41 = vsub.f32 %v2474_v34, %v972_v49  ;;  %v1047_v10 = vsub.f32 %v2476_v35, %v972_v49  ;;  %v1052_v13 = vsub.f32 %v2490_v42, %v981_v24 }
 0x2c3   : > { %v2713_v28 = vpop.eup %1945  ;;  %1971 = vpow2.f32 %v1160_v33  ;;  %v1053_v61 = vsub.f32 %v2997_v20, %v981_v24  ;;  %1289 = vadd.xlane.f32.xlu0 %v1288_v40 }
 0x2c4   : > { %v2716_v46 = vpop.eup %1947  ;;  %1973 = vpow2.f32 %v1170_v12  ;;  %v1150_v7 = vmul.f32 1.442695, %v1046_v41  ;;  %v1152_v51 = vmul.f32 1.442695, %v1047_v10  ;;  %v1162_v45 = vmul.f32 1.442695, %v1052_v13 }
 0x2c5   : > { %v2718_v1 = vpop.eup %1949  ;;  %1975 = vpow2.f32 %v1172_v50  ;;  %v1164_v34 = vmul.f32 1.442695, %v1053_v61  ;;  %v966_v14 = vpop.xlane.xlu0 %965  ;;  %v1282_v42 = vadd.f32 %v2716_v46, %v2713_v28  ;;  %v3001_v41 = vld [vmem:[#allocation12_spill] sm:$0xff]  ;;  %v3002_v13 = vld [vmem:[#allocation13_spill] sm:$0xff] }
 0x2c6   : > { %v975_v35 = vpop.xlane.xlu1 %974  ;;  %v2722_v17 = vpop.eup %1951  ;;  %1977 = vpow2.f32 %v1150_v7  ;;  %v1042_v29 = vsub.f32 %v2458_v25, %v966_v14  ;;  %v1043_v57 = vsub.f32 %v2998_v32, %v966_v14  ;;  %v3003_v61 = vld [vmem:[#allocation17_spill] sm:$0xff] }
 0x2c7   : > { %v1048_v11 = vsub.f32 %v2999_v52, %v975_v35  ;;  %v2727_v56 = vpop.eup %1953  ;;  %1979 = vpow2.f32 %v1152_v51  ;;  %v1049_v53 = vsub.f32 %v3000_v5, %v975_v35  ;;  %1283 = vadd.xlane.f32.xlu0 %v1282_v42  ;;  %v1291_v6 = vadd.f32 %v2722_v17, %v2718_v1 }
 0x2c8   : > { %v2732_v9 = vpop.eup %1955  ;;  %1981 = vpow2.f32 %v1162_v45  ;;  %v1142_v18 = vmul.f32 1.442695, %v1042_v29  ;;  %v1144_v26 = vmul.f32 1.442695, %v1043_v57  ;;  %v3004_v45 = vld [vmem:[#allocation18_spill] sm:$0xff] }
 0x2c9   : > { %v1154_v33 = vmul.f32 1.442695, %v1048_v11  ;;  %v2734_v25 = vpop.eup %1957  ;;  %1983 = vpow2.f32 %v1164_v34  ;;  %v1156_v12 = vmul.f32 1.442695, %v1049_v53  ;;  %1292 = vadd.xlane.f32.xlu1 %v1291_v6  ;;  %v960_v50 = vpop.xlane.xlu0 %959  ;;  %v1276_v24 = vadd.f32 %v2732_v9, %v2727_v56  ;;  %v3005_v6 = vld [vmem:[#allocation14_spill] sm:$0xff] }
 0x2ca   : > { %v969_v49 = vpop.xlane.xlu1 %968  ;;  %v2738_v40 = vpop.eup %1959  ;;  %1985 = vpow2.f32 %v1142_v18  ;;  %v1038_v10 = vsub.f32 %v3001_v41, %v960_v50  ;;  %v1039_v20 = vsub.f32 %v3002_v13, %v960_v50 }
 0x2cb   : > { %v1044_v7 = vsub.f32 %v3003_v61, %v969_v49  ;;  %v2743_v51 = vpop.eup %1961  ;;  %1987 = vpow2.f32 %v1144_v26  ;;  %v1045_v34 = vsub.f32 %v3004_v45, %v969_v49  ;;  %1277 = vadd.xlane.f32.xlu0 %v1276_v24  ;;  %v1285_v14 = vadd.f32 %v2738_v40, %v2734_v25  ;;  %v3006_v26 = vld [vmem:[#allocation15_spill] sm:$0xff] }
 0x2cc   : > { %v2748_v35 = vpop.eup %1963  ;;  %1989 = vpow2.f32 %v1154_v33  ;;  %v1134_v42 = vmul.f32 1.442695, %v1038_v10  ;;  %v1136_v29 = vmul.f32 1.442695, %v1039_v20 }
 0x2cd   : > { %v1146_v32 = vmul.f32 1.442695, %v1044_v7  ;;  %v2750_v57 = vpop.eup %1965  ;;  %1991 = vpow2.f32 %v1156_v12  ;;  %v1148_v52 = vmul.f32 1.442695, %v1045_v34  ;;  %1286 = vadd.xlane.f32.xlu1 %v1285_v14  ;;  %v1270_v5 = vadd.f32 %v2748_v35, %v2743_v51 }
 0x2ce   : > { %v963_v11 = vpop.xlane.xlu1 %962  ;;  %v2754_v53 = vpop.eup %1967  ;;  %1993 = vpow2.f32 %v1134_v42 }
 0x2cf   : > { %v1040_v18 = vsub.f32 %v3005_v6, %v963_v11  ;;  %v1041_v50 = vsub.f32 %v3006_v26, %v963_v11  ;;  %v2758_v33 = vpop.eup %1969  ;;  %1995 = vpow2.f32 %v1136_v29  ;;  %1271 = vadd.xlane.f32.xlu0 %v1270_v5  ;;  %v1279_v12 = vadd.f32 %v2754_v53, %v2750_v57 }
 0x2d0   : > { %v2762_v49 = vpop.eup %1971  ;;  %1997 = vpow2.f32 %v1146_v32 }
 0x2d1   : > { %v1138_v24 = vmul.f32 1.442695, %v1040_v18  ;;  %v1140_v41 = vmul.f32 1.442695, %v1041_v50  ;;  %v2764_v10 = vpop.eup %1973  ;;  %1999 = vpow2.f32 %v1148_v52  ;;  %1280 = vadd.xlane.f32.xlu1 %v1279_v12  ;;  %v1264_v13 = vadd.f32 %v2762_v49, %v2758_v33 }
 0x2d2   : > { %v2768_v20 = vpop.eup %1975 }
 0x2d3   : > { %2001 = vpow2.f32 %v1138_v24  ;;  %v2770_v61 = vpop.eup %1977  ;;  %1265 = vadd.xlane.f32.xlu0 %v1264_v13  ;;  %v1273_v7 = vadd.f32 %v2768_v20, %v2764_v10 }
 0x2d4   : > { %3007 = vst [vmem:[#allocation22_spill] sm:$0xff] %v2770_v61  ;;  %2003 = vpow2.f32 %v1140_v41  ;;  %v2774_v45 = vpop.eup %1979 }
 0x2d5   : > { %3008 = vst [vmem:[#allocation21_spill] sm:$0xff] %v2774_v45  ;;  %v2776_v34 = vpop.eup %1981  ;;  %1274 = vadd.xlane.f32.xlu1 %v1273_v7  ;;  %v1258_v14 = vadd.f32 %v2774_v45, %v2770_v61 }
 0x2d6   : > { %v2780_v42 = vpop.eup %1983 }
 0x2d7   : > { %v2782_v29 = vpop.eup %1985  ;;  %1259 = vadd.xlane.f32.xlu0 %v1258_v14  ;;  %v1267_v32 = vadd.f32 %v2780_v42, %v2776_v34 }
 0x2d8   : > { %3009 = vst [vmem:[#allocation16_spill] sm:$0xff] %v2782_v29  ;;  %v2786_v52 = vpop.eup %1987 }
 0x2d9   : > { %3010 = vst [vmem:[#allocation19_spill] sm:$0xff] %v2786_v52  ;;  %v2788_v11 = vpop.eup %1989  ;;  %1268 = vadd.xlane.f32.xlu1 %v1267_v32  ;;  %v1252_v5 = vadd.f32 %v2786_v52, %v2782_v29 }
 0x2da   : > { %3011 = vst [vmem:[#allocation20_spill] sm:$0xff] %v2788_v11  ;;  %v2792_v6 = vpop.eup %1991 }
 0x2db   : > { %3012 = vst [vmem:[#allocation12_spill] sm:$0xff] %v2792_v6  ;;  %v2794_v18 = vpop.eup %1993  ;;  %1253 = vadd.xlane.f32.xlu0 %v1252_v5  ;;  %v1261_v26 = vadd.f32 %v2792_v6, %v2788_v11  ;;  %v2069_v5 = vld [vmem:[%s2290_s27] sm:$0xff]  ;;  %s1586_s27 = scalar_lea.hbm %s2932_s6, %s1747_s16 }
 0x2dc   : > { %3013 = vst [vmem:[#allocation13_spill] sm:$0xff] %v2794_v18  ;;  %v2798_v50 = vpop.eup %1995 }
 0x2dd   : > { %3014 = vst [vmem:[#allocation17_spill] sm:$0xff] %v2798_v50  ;;  %v2800_v12 = vpop.eup %1997  ;;  %1262 = vadd.xlane.f32.xlu1 %v1261_v26  ;;  %v1246_v24 = vadd.f32 %v2798_v50, %v2794_v18  ;;  %v1738_v26 = vcombine.high %v2069_v5, %v2069_v5 }
 0x2de   : > { %3015 = vst [vmem:[#allocation18_spill] sm:$0xff] %v2800_v12  ;;  %v2804_v41 = vpop.eup %1999 }
 0x2df   : > { %3016 = vst [vmem:[#allocation14_spill] sm:$0xff] %v2804_v41  ;;  %1247 = vadd.xlane.f32.xlu0 %v1246_v24  ;;  %v1255_v7 = vadd.f32 %v2804_v41, %v2800_v12  ;;  %1469 = vmatprep.mubr.bf16.mxu0 %v1738_v26 }
 0x2e0   : > { %v2806_v13 = vpop.eup %2001 }
 0x2e1   : > { %3017 = vst [vmem:[#allocation15_spill] sm:$0xff] %v2806_v13  ;;  %v2810_v14 = vpop.eup %2003  ;;  %1256 = vadd.xlane.f32.xlu1 %v1255_v7 }
 0x2e2   : > { %3018 = vst [vmem:[#allocation23_spill] sm:$0xff] %v2810_v14  ;;  %v1249_v32 = vadd.f32 %v2810_v14, %v2806_v13 }
 0x2e5   : > { %1250 = vadd.xlane.f32.xlu1 %v1249_v32 }
 0x30c   : > { %v1242_v29 = vpop.xlane.xlu0 %1241 }
 0x30d   : > { %2005 = vrcp.f32 %v1242_v29 }
 0x310   : > { %v1236_v18 = vpop.xlane.xlu0 %1235  ;;  %v1245_v50 = vpop.xlane.xlu1 %1244 }
 0x311   : > { %2007 = vrcp.f32 %v1245_v50 }
 0x312   : > { %2009 = vrcp.f32 %v1236_v18 }
 0x314   : > { %v1230_v24 = vpop.xlane.xlu0 %1229  ;;  %v1239_v52 = vpop.xlane.xlu1 %1238 }
 0x315   : > { %2011 = vrcp.f32 %v1239_v52 }
 0x316   : > { %2013 = vrcp.f32 %v1230_v24 }
 0x318   : > { %v1224_v12 = vpop.xlane.xlu0 %1223  ;;  %v1233_v41 = vpop.xlane.xlu1 %1232 }
 0x319   : > { %2015 = vrcp.f32 %v1233_v41 }
 0x31a   : > { %v2006_v7 = vpop.eup %2005  ;;  %2017 = vrcp.f32 %v1224_v12 }
 0x31b   : > { %v1355_v26 = vmul.f32 %v2006_v7, %v2586_v8  ;;  %v1354_v52 = vmul.f32 %v2006_v7, %v2584_v4 }
 0x31c   : > { %v1218_v13 = vpop.xlane.xlu0 %1217  ;;  %v1227_v32 = vpop.xlane.xlu1 %1226 }
 0x31d   : > { %2019 = vrcp.f32 %v1227_v32 }
 0x31e   : > { %v2008_v5 = vpop.eup %2007  ;;  %2021 = vrcp.f32 %v1218_v13 }
 0x31f   : > { %v2010_v29 = vpop.eup %2009  ;;  %v1357_v18 = vmul.f32 %v2008_v5, %v2600_v21  ;;  %v1356_v24 = vmul.f32 %v2008_v5, %v2597_v31 }
 0x320   : > { %v1212_v14 = vpop.xlane.xlu0 %1211  ;;  %v1221_v50 = vpop.xlane.xlu1 %1220  ;;  %v1351_v61 = vmul.f32 %v2010_v29, %v2582_v58  ;;  %v1350_v45 = vmul.f32 %v2010_v29, %v2578_v2 }
 0x321   : > { %2023 = vrcp.f32 %v1221_v50  ;;  %v1413_v41 = vpack.c.bf16 %v1357_v18, %v1355_v26  ;;  %v1412_v11 = vpack.c.bf16 %v1356_v24, %v1354_v52 }
 0x322   : > { %v2012_v12 = vpop.eup %2011  ;;  %2025 = vrcp.f32 %v1212_v14 }
 0x323   : > { %v2014_v32 = vpop.eup %2013  ;;  %1437 = vmatprep.subr.bf16.mxu0 %v1413_v41  ;;  %v1353_v13 = vmul.f32 %v2012_v12, %v2594_v16  ;;  %v1352_v21 = vmul.f32 %v2012_v12, %v2589_v38 }
 0x324   : > { %v1206_v8 = vpop.xlane.xlu0 %1205  ;;  %v1215_v6 = vpop.xlane.xlu1 %1214  ;;  %1438 = vmatpush1.bf16.msra.mxu0 %v1412_v11  ;;  %v1347_v5 = vmul.f32 %v2014_v32, %v2614_v44  ;;  %v1346_v50 = vmul.f32 %v2014_v32, %v2612_v62 }
 0x325   : > { %2027 = vrcp.f32 %v1215_v6  ;;  %v1411_v4 = vpack.c.bf16 %v1353_v13, %v1351_v61  ;;  %v1410_v31 = vpack.c.bf16 %v1352_v21, %v1350_v45 }
 0x326   : > { %v2016_v7 = vpop.eup %2015  ;;  %2029 = vrcp.f32 %v1206_v8 }
 0x327   : > { %1439 = vmatprep.subr.bf16.mxu0 %v1411_v4  ;;  %v1349_v26 = vmul.f32 %v2016_v7, %v2610_v59  ;;  %v1348_v16 = vmul.f32 %v2016_v7, %v2604_v39  ;;  %v2018_v2 = vpop.eup %2017 }
 0x328   : > { %v1200_v58 = vpop.xlane.xlu0 %1199  ;;  %v1209_v14 = vpop.xlane.xlu1 %1208  ;;  %1440 = vmatpush1.bf16.msra.mxu0 %v1410_v31  ;;  %v1343_v44 = vmul.f32 %v2018_v2, %v2630_v63  ;;  %v1342_v29 = vmul.f32 %v2018_v2, %v2628_v3 }
 0x329   : > { %2031 = vrcp.f32 %v1209_v14  ;;  %v1409_v38 = vpack.c.bf16 %v1349_v26, %v1347_v5  ;;  %v1408_v11 = vpack.c.bf16 %v1348_v16, %v1346_v50  ;;  %v3021_v16 = vld [vmem:[#allocation10_spill] sm:$0xff] }
 0x32a   : > { %v2020_v61 = vpop.eup %2019  ;;  %2033 = vrcp.f32 %v1200_v58 }
 0x32b   : > { %1441 = vmatprep.subr.bf16.mxu0 %v1409_v38  ;;  %v1345_v6 = vmul.f32 %v2020_v61, %v2626_v15  ;;  %v1344_v59 = vmul.f32 %v2020_v61, %v2619_v27  ;;  %v2022_v62 = vpop.eup %2021  ;;  %v3022_v38 = vld [vmem:[#allocation9_spill] sm:$0xff]  ;;  %v3023_v61 = vld [vmem:[#allocation8_spill] sm:$0xff] }
 0x32c   : > { %v1203_v45 = vpop.xlane.xlu1 %1202  ;;  %1442 = vmatpush1.bf16.msra.mxu0 %v1408_v11  ;;  %v1339_v24 = vmul.f32 %v2022_v62, %v2642_v22  ;;  %v1338_v12 = vmul.f32 %v2022_v62, %v2640_v37 }
 0x32d   : > { %2035 = vrcp.f32 %v1203_v45  ;;  %v1407_v39 = vpack.c.bf16 %v1345_v6, %v1343_v44  ;;  %v1406_v18 = vpack.c.bf16 %v1344_v59, %v1342_v29 }
 0x32e   : > { %v2024_v52 = vpop.eup %2023 }
 0x32f   : > { %1443 = vmatprep.subr.bf16.mxu0 %v1407_v39  ;;  %v1341_v41 = vmul.f32 %v2024_v52, %v2638_v30  ;;  %v1340_v63 = vmul.f32 %v2024_v52, %v2632_v0  ;;  %v2026_v15 = vpop.eup %2025 }
 0x330   : > { %1444 = vmatpush1.bf16.msra.mxu0 %v1406_v18  ;;  %v1335_v8 = vmul.f32 %v2026_v15, %v2654_v47  ;;  %v1334_v21 = vmul.f32 %v2026_v15, %v2652_v60  ;;  %v3019_v47 = vld [vmem:[#allocation11_spill] sm:$0xff] }
 0x331   : > { %v1405_v3 = vpack.c.bf16 %v1341_v41, %v1339_v24  ;;  %v1404_v32 = vpack.c.bf16 %v1340_v63, %v1338_v12 }
 0x332   : > { %v2028_v27 = vpop.eup %2027 }
 0x333   : > { %1445 = vmatprep.subr.bf16.mxu0 %v1405_v3  ;;  %v1337_v13 = vmul.f32 %v2028_v27, %v2650_v43  ;;  %v1336_v22 = vmul.f32 %v2028_v27, %v2644_v36  ;;  %v2030_v4 = vpop.eup %2029  ;;  %v3020_v36 = vld [vmem:[#allocation7_spill] sm:$0xff] }
 0x334   : > { %1446 = vmatpush1.bf16.msra.mxu0 %v1404_v32  ;;  %v1331_v7 = vmul.f32 %v2030_v4, %v2662_v55  ;;  %v1330_v58 = vmul.f32 %v2030_v4, %v2656_v19 }
 0x335   : > { %v1403_v30 = vpack.c.bf16 %v1337_v13, %v1335_v8  ;;  %v1402_v37 = vpack.c.bf16 %v1336_v22, %v1334_v21 }
 0x336   : > { %v2032_v31 = vpop.eup %2031 }
 0x337   : > { %v2034_v0 = vpop.eup %2033  ;;  %1447 = vmatprep.subr.bf16.mxu0 %v1403_v30  ;;  %v1333_v5 = vmul.f32 %v2032_v31, %v2668_v48  ;;  %v1332_v14 = vmul.f32 %v2032_v31, %v3019_v47 }
 0x338   : > { %1448 = vmatpush1.bf16.msra.mxu0 %v1402_v37  ;;  %v1327_v50 = vmul.f32 %v2034_v0, %v3020_v36  ;;  %v1326_v11 = vmul.f32 %v2034_v0, %v3022_v38 }
 0x339   : > { %v1401_v60 = vpack.c.bf16 %v1333_v5, %v1331_v7  ;;  %v1400_v26 = vpack.c.bf16 %v1332_v14, %v1330_v58 }
 0x33a   : > { %v2036_v43 = vpop.eup %2035 }
 0x33b   : > { %v1329_v2 = vmul.f32 %v2036_v43, %v3021_v16  ;;  %v1328_v45 = vmul.f32 %v2036_v43, %v3023_v61  ;;  %1449 = vmatprep.subr.bf16.mxu0 %v1401_v60 }
 0x33c   : > { %1450 = vmatpush1.bf16.msra.mxu0 %v1400_v26 }
 0x33d   : > { %v1399_v55 = vpack.c.bf16 %v1329_v2, %v1327_v50  ;;  %v1398_v48 = vpack.c.bf16 %v1328_v45, %v1326_v11 }
 0x33f   : > { %1451 = vmatprep.subr.bf16.mxu0 %v1399_v55  ;;  %v3024_v55 = vld [vmem:[#allocation21_spill] sm:$0xff] }
 0x340   : > { %1452 = vmatpush1.bf16.msra.mxu0 %v1398_v48 }
 0x34c   : > { %v1290_v19 = vpop.xlane.xlu0 %1289 }
 0x34d   : > { %2037 = vrcp.f32 %v1290_v19  ;;  %v3025_v19 = vld [vmem:[#allocation12_spill] sm:$0xff] }
 0x350   : > { %v1284_v44 = vpop.xlane.xlu0 %1283 }
 0x352   : > { %v1293_v6 = vpop.xlane.xlu1 %1292 }
 0x353   : > { %2039 = vrcp.f32 %v1293_v6  ;;  %v3026_v6 = vld [vmem:[#allocation22_spill] sm:$0xff] }
 0x354   : > { %2041 = vrcp.f32 %v1284_v44  ;;  %v1278_v29 = vpop.xlane.xlu0 %1277 }
 0x356   : > { %v1287_v59 = vpop.xlane.xlu1 %1286 }
 0x357   : > { %2043 = vrcp.f32 %v1287_v59  ;;  %v3027_v59 = vld [vmem:[#allocation20_spill] sm:$0xff] }
 0x358   : > { %2045 = vrcp.f32 %v1278_v29  ;;  %v1272_v62 = vpop.xlane.xlu0 %1271 }
 0x35a   : > { %v1281_v39 = vpop.xlane.xlu1 %1280  ;;  %v2038_v52 = vpop.eup %2037 }
 0x35b   : > { %2047 = vrcp.f32 %v1281_v39  ;;  %v1387_v63 = vmul.f32 %v2038_v52, %v2706_v23  ;;  %v1386_v32 = vmul.f32 %v2038_v52, %v2703_v54  ;;  %v3029_v52 = vld [vmem:[#allocation14_spill] sm:$0xff] }
 0x35c   : > { %2049 = vrcp.f32 %v1272_v62  ;;  %v1266_v18 = vpop.xlane.xlu0 %1265 }
 0x35e   : > { %v1275_v24 = vpop.xlane.xlu1 %1274 }
 0x35f   : > { %2051 = vrcp.f32 %v1275_v24 }
 0x360   : > { %v2040_v41 = vpop.eup %2039  ;;  %v1260_v12 = vpop.xlane.xlu0 %1259  ;;  %2053 = vrcp.f32 %v1266_v18 }
 0x361   : > { %v2042_v15 = vpop.eup %2041  ;;  %v1389_v3 = vmul.f32 %v2040_v41, %v2722_v17  ;;  %v1388_v27 = vmul.f32 %v2040_v41, %v2718_v1  ;;  %v3030_v41 = vld [vmem:[#allocation16_spill] sm:$0xff] }
 0x362   : > { %v1269_v8 = vpop.xlane.xlu1 %1268  ;;  %v1383_v30 = vmul.f32 %v2042_v15, %v2716_v46  ;;  %v1382_v31 = vmul.f32 %v2042_v15, %v2713_v28 }
 0x363   : > { %2055 = vrcp.f32 %v1269_v8  ;;  %v1429_v13 = vpack.c.bf16 %v1389_v3, %v1387_v63  ;;  %v1428_v21 = vpack.c.bf16 %v1388_v27, %v1386_v32  ;;  %v3031_v63 = vld [vmem:[#allocation18_spill] sm:$0xff] }
 0x364   : > { %v2044_v22 = vpop.eup %2043  ;;  %v1254_v4 = vpop.xlane.xlu0 %1253  ;;  %2057 = vrcp.f32 %v1260_v12 }
 0x365   : > { %v2046_v37 = vpop.eup %2045  ;;  %1453 = vmatprep.subr.bf16.mxu0 %v1429_v13  ;;  %v1385_v23 = vmul.f32 %v2044_v22, %v2738_v40  ;;  %v1384_v17 = vmul.f32 %v2044_v22, %v2734_v25  ;;  %v3032_v13 = vld [vmem:[#allocation17_spill] sm:$0xff]  ;;  %v3033_v22 = vld [vmem:[#allocation23_spill] sm:$0xff] }
 0x366   : > { %1454 = vmatpush2.bf16.msra.mxu0 %v1428_v21  ;;  %v1263_v54 = vpop.xlane.xlu1 %1262  ;;  %v1379_v5 = vmul.f32 %v2046_v37, %v2732_v9  ;;  %v1378_v47 = vmul.f32 %v2046_v37, %v2727_v56 }
 0x367   : > { %2059 = vrcp.f32 %v1263_v54  ;;  %v1427_v1 = vpack.c.bf16 %v1385_v23, %v1383_v30  ;;  %v1426_v0 = vpack.c.bf16 %v1384_v17, %v1382_v31  ;;  %v3034_v30 = vld [vmem:[#allocation13_spill] sm:$0xff]  ;;  %v3035_v23 = vld [vmem:[#allocation15_spill] sm:$0xff] }
 0x368   : > { %v2048_v7 = vpop.eup %2047  ;;  %2061 = vrcp.f32 %v1254_v4  ;;  %v1248_v28 = vpop.xlane.xlu0 %1247 }
 0x369   : > { %v2050_v58 = vpop.eup %2049  ;;  %1455 = vmatprep.subr.bf16.mxu0 %v1427_v1  ;;  %v1381_v46 = vmul.f32 %v2048_v7, %v2754_v53  ;;  %v1380_v40 = vmul.f32 %v2048_v7, %v2750_v57  ;;  %v3036_v1 = vld [vmem:[#allocation6_spill] sm:$0xff]  ;;  %v1488_v7 = vld [vmem:[%s2931_s5] sm:$0xf] }
 0x36a   : > { %1456 = vmatpush2.bf16.msra.mxu0 %v1426_v0  ;;  %v1257_v25 = vpop.xlane.xlu1 %1256  ;;  %v1375_v26 = vmul.f32 %v2050_v58, %v2748_v35  ;;  %v1374_v36 = vmul.f32 %v2050_v58, %v2743_v51  ;;  %v2149_v0 = vmov 0.0   ;;  %1491 = vperm.xlu0 %1857, %v1488_v7  }
 0x36b   : > { %2063 = vrcp.f32 %v1257_v25  ;;  %v1425_v14 = vpack.c.bf16 %v1381_v46, %v1379_v5  ;;  %v1424_v43 = vpack.c.bf16 %v1380_v40, %v1378_v47  ;;  %v1485_v46 = vld [vmem:[%s2930_s4] sm:$0xf] }
 0x36c   : > { %v2052_v60 = vpop.eup %2051  ;;  %2065 = vrcp.f32 %v1248_v28 }
 0x36d   : > { %1457 = vmatprep.subr.bf16.mxu0 %v1425_v14  ;;  %v1377_v9 = vmul.f32 %v2052_v60, %v2768_v20  ;;  %v1376_v53 = vmul.f32 %v2052_v60, %v2764_v10  ;;  %v2054_v56 = vpop.eup %2053 }
 0x36e   : > { %1458 = vmatpush2.bf16.msra.mxu0 %v1424_v43  ;;  %v1251_v57 = vpop.xlane.xlu1 %1250  ;;  %v1371_v38 = vmul.f32 %v2054_v56, %v2762_v49  ;;  %v1370_v11 = vmul.f32 %v2054_v56, %v2758_v33 }
 0x36f   : > { %2067 = vrcp.f32 %v1251_v57  ;;  %v1423_v50 = vpack.c.bf16 %v1377_v9, %v1375_v26  ;;  %v1422_v16 = vpack.c.bf16 %v1376_v53, %v1374_v36 }
 0x370   : > { %v2056_v2 = vpop.eup %2055 }
 0x371   : > { %1459 = vmatprep.subr.bf16.mxu0 %v1423_v50  ;;  %v1373_v35 = vmul.f32 %v2056_v2, %v2780_v42  ;;  %v1372_v20 = vmul.f32 %v2056_v2, %v2776_v34  ;;  %v2058_v61 = vpop.eup %2057  ;;  %v3028_v34 = vld [vmem:[#allocation19_spill] sm:$0xff] }
 0x372   : > { %1460 = vmatpush2.bf16.msra.mxu0 %v1422_v16  ;;  %v1367_v48 = vmul.f32 %v2058_v61, %v3024_v55  ;;  %v1366_v29 = vmul.f32 %v2058_v61, %v3026_v6 }
 0x373   : > { %v1421_v51 = vpack.c.bf16 %v1373_v35, %v1371_v38  ;;  %v1420_v10 = vpack.c.bf16 %v1372_v20, %v1370_v11 }
 0x374   : > { %v2060_v45 = vpop.eup %2059 }
 0x375   : > { %1461 = vmatprep.subr.bf16.mxu0 %v1421_v51  ;;  %v1369_v44 = vmul.f32 %v2060_v45, %v3025_v19  ;;  %v1368_v49 = vmul.f32 %v2060_v45, %v3027_v59  ;;  %v2062_v62 = vpop.eup %2061 }
 0x376   : > { %1462 = vmatpush2.bf16.msra.mxu0 %v1420_v10  ;;  %v1363_v18 = vmul.f32 %v2062_v62, %v3028_v34  ;;  %v1362_v12 = vmul.f32 %v2062_v62, %v3030_v41 }
 0x377   : > { %v1419_v42 = vpack.c.bf16 %v1369_v44, %v1367_v48  ;;  %v1418_v33 = vpack.c.bf16 %v1368_v49, %v1366_v29 }
 0x378   : > { %v2064_v39 = vpop.eup %2063 }
 0x379   : > { %1463 = vmatprep.subr.bf16.mxu0 %v1419_v42  ;;  %v1365_v24 = vmul.f32 %v2064_v39, %v3029_v52  ;;  %v1364_v15 = vmul.f32 %v2064_v39, %v3031_v63  ;;  %v2066_v3 = vpop.eup %2065 }
 0x37a   : > { %1464 = vmatpush2.bf16.msra.mxu0 %v1418_v33  ;;  %v1359_v21 = vmul.f32 %v2066_v3, %v3032_v13  ;;  %v1358_v37 = vmul.f32 %v2066_v3, %v3034_v30 }
 0x37b   : > { %v1417_v32 = vpack.c.bf16 %v1365_v24, %v1363_v18  ;;  %v1416_v27 = vpack.c.bf16 %v1364_v15, %v1362_v12 }
 0x37c   : > { %v2068_v8 = vpop.eup %2067 }
 0x37d   : > { %1465 = vmatprep.subr.bf16.mxu0 %v1417_v32  ;;  %v1361_v4 = vmul.f32 %v2068_v8, %v3033_v22  ;;  %v1360_v31 = vmul.f32 %v2068_v8, %v3035_v23 }
 0x37e   : > { %1466 = vmatpush2.bf16.msra.mxu0 %v1416_v27 }
 0x37f   : > { %v1415_v17 = vpack.c.bf16 %v1361_v4, %v1359_v21  ;;  %v1414_v54 = vpack.c.bf16 %v1360_v31, %v1358_v37 }
 0x381   : > { %1467 = vmatprep.subr.bf16.mxu0 %v1415_v17 }
 0x382   : > { %1468 = vmatpush2.bf16.msra.mxu0 %v1414_v54 }
 0x385   : > { %1470 = vmatmul.mubr.bf16.vlgmr.msra.gmra.mxu0 %v3036_v1 }
 0x386   : > { %1561 = vmatprep.mubr.f32.mxu0 %v2149_v0 }
 0x3e5   : > { %v1492_v25 = vpop.permute.xlu0 %1491 }
 0x445   : > { %v1471_v5 = vpop.f32.mrf.mxu0 }
 0x447   : > { %v1473_v58 = vpop.f32.mrf.mxu0 }
 0x448   : > { %1527 = vmatprep.subr.mxu0 %v1473_v58 }
 0x449   : > { %v1475_v47 = vpop.f32.mrf.mxu0  ;;  %1528 = vmatpush1.msra.mxu0 %v1471_v5 }
 0x44a   : > { %1739 = vmatmul.mubr.msk.f32.vlgmr.msra.gmra.mxu0 %vm661_vm3, %v1485_v46 }
 0x44b   : > { %v1476_v40 = vpop.f32.mrf.mxu0 }
 0x50a   : > { %v1563_v28 = vpop.f32.mrf.mxu0 }
 0x50b   : > { %v1564_v43 = vadd.f32 %v1563_v28, %v1492_v25 }
 0x50c   : > { %v1565_v14 = vpop.f32.mrf.mxu0 }
 0x50d   : > { %v1566_v60 = vadd.f32 %v1565_v14, %v1492_v25 }
 0x50f   : > { %v1570_v26 = vcombine.low %v1564_v43, %v1566_v60 }
 0x511   : > { %1572 = vst [vmem:[%s282_s17] sm:$0xff] %v1570_v26 }
 0x512   : > { %2083 = shalt.err (!%p2080_p5)
}
 0x513   : > { %s2084_s12 = scalar_lea.hbm %s1586_s27, 128  ;;  %s2088_s15 = scalar_lea.hbm %s2932_s6, 256 }
 0x514   : > { %p2085_p6 = scmp.ne.s32.totalorder %s1586_s27, %s2084_s12  ;;  %p2089_p10 = scmp.lt.s32.totalorder %s1586_s27, %s2932_s6 }
 0x515   : > { %p2090_p11 = scmp.lt.s32.totalorder %s2088_s15, %s2084_s12 }
 0x516   : > { %p2086_p7 = pnand %p2085_p6, %p2226_p4 }
 0x517   : > { %p2091_p12 = por %p2090_p11, %p2089_p10 }
 0x518   : > { %p2087_p9 = pneg %p2086_p7 }
 0x51a   : > { %p2092_p13 = pnand %p2091_p12, %p2087_p9 }
 0x51c   : > { %2095 = shalt.err (!%p2092_p13)
}
 0x51d   : > { %1800 = dma.vmem_to_hbm [thread:$0]  (%p2226_p4), %s1589_s18, 128, %s1586_s27, %s1574_s28  }
 0x51e PF: > { %p1806_p0 = scmp.ge.s32.totalorder %s2146_s26, 2  ;;  %s1600_s19 = sand.u32 1, %s2126_s21  }
 0x51f   : > { %s1601_s20 = scalar_lea.sflag [#allocation4], %s1600_s19 }
 0x520   : > { %p1803_p1 = pnand %p1806_p0, %p2233_p8 }
 0x522   : > { %p1804_p2 = pneg %p1803_p1 }
 0x524   : > { %2121 = dma.done.wait (%p1804_p2), %s1601_s20, 128  }
 0x525   : > { %2123 = vsyncadd (%p1804_p2), %s1601_s20, 4294967168  ;;  %s19_s26 = sadd.s32 1, %s2146_s26   ;;  %s3037_s21 = smov %s2130_s22 }
 0x526   : > { %p16_p3 = scmp.ge.s32.totalorder %s19_s26, 4   ;;  %s3038_s22 = smov %s2134_s23 }
 0x527   : > { %s3039_s23 = smov %s2239_s10  ;;  %s3040_s24 = smov %s2142_s25 }
 0x528   : > { %s3041_s25 = smov %s3043_s29  ;;  %18 = sbr.rel (!%p16_p3) target bundleno = 4 (0x4), region = 91 }
 0x52d   :  { %1606 = vsyncpa [#allocation4], 1 }
 0x52e   :  { %1608 = vsyncpa [#allocation4 + $0x1], 1 }

</bundles_post_ra>
